<compile_context>
chip_gen: v6e
topology: v6e:2x2x1
jax: 0.10.0
libtpu: 0.0.40
codegen_flags: <defaults>
</compile_context>

<pallas_src>
import numpy as np

import jax
import jax.numpy as jnp
from jax import lax
from jax.experimental import pallas as pl
from jax.experimental.pallas import tpu as pltpu


def _round_up(x, m):
    return (x + m - 1) // m * m


def _make_kernel(W, Cin, Cout, convs, tile, halo):
    """convs: tuple of (dilation, padding) for the two convs that are summed."""

    def kernel(xw_ref, w_ref, b_ref, m_ref, o_ref, slab_ref):
        # xw_ref  : (1, 1, Cin, WIN)     bf16 halo'd x window for this (n, tile)
        # w_ref   : (Cout, 18*Cin)       bf16 fused im2col weights (tap-major)
        # b_ref   : (Cout, 1)            f32  summed biases
        # m_ref   : (18, TILE)           bf16 per-tap border-validity masks
        # o_ref   : (1, Cout, TILE)      f32  output tile (NCHW, spatial flat)
        # slab_ref: (18*Cin, TILE)       bf16 VMEM im2col slab (scratch)
        tap = 0
        for d, p in convs:                       # statically unrolled: 2 convs
            for kh in range(3):
                for kw in range(3):
                    dr = kh * d - p              # row offset in {-d, 0, d}
                    dc = kw * d - p              # col offset in {-d, 0, d}
                    off = dr * W + dc            # flat-spatial offset
                    # Re-read the window inside the tap body to bound live
                    # ranges across the 18-tap unroll (vld slots are cheap,
                    # vreg spills are not).  All slicing below is static.
                    x_win = xw_ref[0, 0]                         # (Cin, WIN) bf16
                    patch = x_win[:, halo + off: halo + off + tile]
                    if not (dr == 0 and dc == 0):
                        # Zero taps that fall outside the H x W image
                        # (replaces conv zero-padding); bf16 * bf16 on the VPU.
                        patch = patch * m_ref[tap:tap + 1, :]
                    slab_ref[tap * Cin:(tap + 1) * Cin, :] = patch
                    tap += 1

        # One fused MXU matmul: (Cout, 18*Cin) @ (18*Cin, TILE) -> (Cout, TILE)
        # bf16 operands, f32 accumulation.  Output stays lane-dense NCHW.
        acc = jnp.dot(w_ref[...], slab_ref[...],
                      preferred_element_type=jnp.float32)
        o_ref[0] = (acc + b_ref[...]).astype(o_ref.dtype)

    return kernel


def classifier_module_forward(x_nchw, weights, biases, dilation_series,
                              padding_series, *, tile_hw=512):
    """Pallas implementation of Classifier_Module.forward.

    x_nchw : (N, Cin, H, W) float32
    weights: list of (Cout, Cin, 3, 3) arrays (PyTorch OIHW layout)
    biases : list of (Cout,) arrays
    Only convs 0 and 1 contribute (early `return` in the PyTorch loop).
    """
    assert len(weights) >= 2, "forward needs at least 2 convs to return a tensor"
    N, Cin, H, W = x_nchw.shape
    Cout = weights[0].shape[0]
    HW = H * W

    convs = tuple((int(dilation_series[i]), int(padding_series[i])) for i in (0, 1))
    for d, p in convs:
        # "same" output size needs padding == dilation for a 3x3 stride-1 conv.
        assert p == d, "only padding == dilation (same-size output) supported"
    n_taps = 9 * len(convs)

    # --- spatial tiling geometry --------------------------------------------
    tile = _round_up(min(tile_hw, _round_up(HW, 128)), 128)
    hw_pad = _round_up(HW, tile)            # flat spatial, padded to tile mult.
    n_tiles = hw_pad // tile
    max_off = max(d * (W + 1) for d, _ in convs)   # largest |flat tap offset|
    halo = _round_up(max_off, 128)
    win = tile + 2 * halo

    # --- activations: NCHW, flat spatial, bf16, halo'd per-tile windows ------
    x_flat = x_nchw.reshape(N, Cin, HW).astype(jnp.bfloat16)
    x_halo = jnp.pad(x_flat, ((0, 0), (0, 0), (halo, (hw_pad - HW) + halo)))
    # Overlapping (Cin, WIN) windows per spatial tile so in-kernel tap
    # extraction needs only static slices.
    x_windows = jnp.stack(
        [x_halo[:, :, t * tile: t * tile + win] for t in range(n_tiles)], axis=1)

    # --- fused im2col weights (Cout, 18*Cin); column blocks in tap order -----
    w_blocks = []
    for ci in range(len(convs)):
        w = weights[ci].astype(jnp.float32)           # (Cout, Cin, 3, 3)
        for kh in range(3):
            for kw in range(3):
                w_blocks.append(w[:, :, kh, kw])      # (Cout, Cin)
    w_fused = jnp.concatenate(w_blocks, axis=1).astype(jnp.bfloat16)

    # Sum of the two biases (both convs are simply added).
    b_sum = (biases[0].astype(jnp.float32)
             + biases[1].astype(jnp.float32)).reshape(Cout, 1)

    # --- static per-tap border-validity masks over flat spatial (bf16 0/1) ---
    masks_np = np.zeros((n_taps, hw_pad), np.float32)
    rows = np.arange(hw_pad) // W
    cols = np.arange(hw_pad) % W
    t = 0
    for d, p in convs:
        for kh in range(3):
            for kw in range(3):
                dr, dc = kh * d - p, kw * d - p
                masks_np[t] = ((rows + dr >= 0) & (rows + dr < H) &
                               (cols + dc >= 0) & (cols + dc < W))
                t += 1
    masks = jnp.asarray(masks_np, dtype=jnp.bfloat16)

    kernel = _make_kernel(W, Cin, Cout, convs, tile, halo)

    # Scoped-VMEM request from the actual footprint (double-buffered blocks +
    # scratch slab) with headroom; floor keeps it trivially safe on all gens.
    vmem_bytes = (2 * Cin * win * 2            # x window blocks (bf16)
                  + n_taps * Cin * tile * 2    # im2col slab scratch (bf16)
                  + 2 * Cout * tile * 4        # output blocks (f32)
                  + 2 * Cout * n_taps * Cin * 2
                  + 2 * n_taps * tile * 2
                  + 2 * Cout * 4)
    vmem_limit = int(min(max(32 * 1024 * 1024, 2 * vmem_bytes),
                         100 * 1024 * 1024))

    cost = pl.CostEstimate(
        flops=2 * N * n_tiles * Cout * n_taps * Cin * tile,
        transcendentals=0,
        bytes_accessed=(x_windows.size * 2 + w_fused.size * 2 + masks.size * 2
                        + b_sum.size * 4 + N * Cout * hw_pad * 4))

    out_flat = pl.pallas_call(
        kernel,
        out_shape=jax.ShapeDtypeStruct((N, Cout, hw_pad), jnp.float32),
        grid=(N, n_tiles),
        in_specs=[
            pl.BlockSpec((1, 1, Cin, win), lambda n, t: (n, t, 0, 0)),
            pl.BlockSpec((Cout, n_taps * Cin), lambda n, t: (0, 0)),
            pl.BlockSpec((Cout, 1), lambda n, t: (0, 0)),
            pl.BlockSpec((n_taps, tile), lambda n, t: (0, t)),
        ],
        out_specs=pl.BlockSpec((1, Cout, tile), lambda n, t: (n, 0, t)),
        scratch_shapes=[pltpu.VMEM((n_taps * Cin, tile), jnp.bfloat16)],
        compiler_params=pltpu.CompilerParams(
            dimension_semantics=("parallel", "parallel"),
            vmem_limit_bytes=vmem_limit),
        cost_estimate=cost,
    )(x_windows, w_fused, b_sum, masks)

    # Drop spatial padding; output is already NCHW (free reshape).
    return out_flat[:, :, :HW].reshape(N, Cout, H, W)


def _reference_forward(x_nchw, weights, biases, dilation_series, padding_series):
    """Plain-JAX reference (lax conv) mirroring the PyTorch forward."""
    def conv(i):
        return lax.conv_general_dilated(
            x_nchw, weights[i],
            window_strides=(1, 1),
            padding=[(padding_series[i],) * 2, (padding_series[i],) * 2],
            rhs_dilation=(dilation_series[i],) * 2,
            dimension_numbers=("NCHW", "OIHW", "NCHW"),
            precision=lax.Precision.HIGHEST,
        ) + biases[i].reshape(1, -1, 1, 1)
    return conv(0) + conv(1)


if __name__ == "__main__":
    # Small synthetic configuration (ASPP-like).
    N, inplanes, H, W = 2, 16, 16, 16
    num_classes = 8
    dilation_series = [2, 4, 6, 8]
    padding_series = [2, 4, 6, 8]

    key = jax.random.PRNGKey(0)
    keys = jax.random.split(key, 1 + 2 * len(dilation_series))

    x = jax.random.normal(keys[0], (N, inplanes, H, W), dtype=jnp.float32)

    # weight ~ N(0, 0.01) as in the module; bias ~ U(-1/sqrt(fan_in), ...) like
    # PyTorch's Conv2d default.
    weights, biases = [], []
    fan_in = inplanes * 3 * 3
    bound = 1.0 / (fan_in ** 0.5)
    for i in range(len(dilation_series)):
        w = 0.01 * jax.random.normal(
            keys[1 + 2 * i], (num_classes, inplanes, 3, 3), dtype=jnp.float32)
        b = jax.random.uniform(
            keys[2 + 2 * i], (num_classes,), minval=-bound, maxval=bound,
            dtype=jnp.float32)
        weights.append(w)
        biases.append(b)

    # tile_hw=128 so the spatial grid axis has >1 tile even at this toy size.
    out = classifier_module_forward(x, weights, biases, dilation_series,
                                    padding_series, tile_hw=128)
    out = jax.block_until_ready(out)

    # Reference computed from the same bf16-rounded operands (the kernel feeds
    # the MXU bf16 with f32 accumulation), so only summation order differs.
    x_r = x.astype(jnp.bfloat16).astype(jnp.float32)
    w_r = [w.astype(jnp.bfloat16).astype(jnp.float32) for w in weights]
    ref = _reference_forward(x_r, w_r, biases, dilation_series, padding_series)
    ref = jax.block_until_ready(ref)

    assert out.shape == (N, num_classes, H, W), out.shape
    max_err = float(jnp.max(jnp.abs(out - ref)))
    assert jnp.allclose(out, ref, rtol=1e-3, atol=1e-3), max_err

    print("KERNEL_OK")
</pallas_src>

<mosaic_0001>
module attributes {stable_mosaic.version = 11 : i64} {
  func.func @kernel(%arg0: i32, %arg1: i32, %arg2: memref<1x1x16x384xbf16, #tpu.memory_space<vmem>>, %arg3: memref<8x288xbf16, #tpu.memory_space<vmem>>, %arg4: memref<8x1xf32, #tpu.memory_space<vmem>>, %arg5: memref<18x128xbf16, #tpu.memory_space<vmem>>, %arg6: memref<1x8x128xf32, #tpu.memory_space<vmem>>, %arg7: memref<288x128xbf16, #tpu.memory_space<vmem>>) attributes {dimension_semantics = [#tpu.dimension_semantics<parallel>, #tpu.dimension_semantics<parallel>], iteration_bounds = array<i64: 2, 2>, scalar_prefetch = 0 : i64, scratch_operands = 1 : i64, tpu.core_type = #tpu.core_type<tc>, window_params = [{transform_indices = @transform_0, window_bounds = array<i64: 1, 1, 16, 384>}, {pipeline_mode = #tpu.pipeline_mode<synchronous>, transform_indices = @transform_1, window_bounds = array<i64: 8, 288>}, {pipeline_mode = #tpu.pipeline_mode<synchronous>, transform_indices = @transform_2, window_bounds = array<i64: 8, 1>}, {transform_indices = @transform_3, window_bounds = array<i64: 18, 128>}, {transform_indices = @transform_4, window_bounds = array<i64: 1, 8, 128>}]} {
    %c0 = arith.constant 0 : index
    %c0_0 = arith.constant 0 : index
    %c0_1 = arith.constant 0 : index
    %c0_2 = arith.constant 0 : index
    %0 = vector.load %arg2[%c0, %c0_0, %c0_1, %c0_2] : memref<1x1x16x384xbf16, #tpu.memory_space<vmem>>, vector<1x1x16x384xbf16>
    %1 = vector.shape_cast %0 : vector<1x1x16x384xbf16> to vector<16x384xbf16>
    %2 = vector.extract_strided_slice %1 {offsets = [0, 94], sizes = [16, 128], strides = [1, 1]} : vector<16x384xbf16> to vector<16x128xbf16>
    %c0_3 = arith.constant 0 : index
    %c0_4 = arith.constant 0 : index
    %3 = vector.load %arg5[%c0_3, %c0_4] : memref<18x128xbf16, #tpu.memory_space<vmem>>, vector<1x128xbf16>
    %4 = vector.broadcast %3 : vector<1x128xbf16> to vector<16x128xbf16>
    %5 = arith.mulf %2, %4 : vector<16x128xbf16>
    %c0_5 = arith.constant 0 : index
    %c0_6 = arith.constant 0 : index
    %6 = vector.load %arg7[%c0_5, %c0_6] : memref<288x128xbf16, #tpu.memory_space<vmem>>, vector<16x128xbf16>
    tpu.vector_store %arg7[%c0_5, %c0_6], %5 {strides = array<i32>} : memref<288x128xbf16, #tpu.memory_space<vmem>>, vector<16x128xbf16>,
    %c0_7 = arith.constant 0 : index
    %c0_8 = arith.constant 0 : index
    %c0_9 = arith.constant 0 : index
    %c0_10 = arith.constant 0 : index
    %7 = vector.load %arg2[%c0_7, %c0_8, %c0_9, %c0_10] : memref<1x1x16x384xbf16, #tpu.memory_space<vmem>>, vector<1x1x16x384xbf16>
    %8 = vector.shape_cast %7 : vector<1x1x16x384xbf16> to vector<16x384xbf16>
    %9 = vector.extract_strided_slice %8 {offsets = [0, 96], sizes = [16, 128], strides = [1, 1]} : vector<16x384xbf16> to vector<16x128xbf16>
    %c1 = arith.constant 1 : index
    %c0_11 = arith.constant 0 : index
    %10 = vector.load %arg5[%c1, %c0_11] : memref<18x128xbf16, #tpu.memory_space<vmem>>, vector<1x128xbf16>
    %11 = vector.broadcast %10 : vector<1x128xbf16> to vector<16x128xbf16>
    %12 = arith.mulf %9, %11 : vector<16x128xbf16>
    %c16 = arith.constant 16 : index
    %c0_12 = arith.constant 0 : index
    %13 = vector.load %arg7[%c16, %c0_12] : memref<288x128xbf16, #tpu.memory_space<vmem>>, vector<16x128xbf16>
    tpu.vector_store %arg7[%c16, %c0_12], %12 {strides = array<i32>} : memref<288x128xbf16, #tpu.memory_space<vmem>>, vector<16x128xbf16>,
    %c0_13 = arith.constant 0 : index
    %c0_14 = arith.constant 0 : index
    %c0_15 = arith.constant 0 : index
    %c0_16 = arith.constant 0 : index
    %14 = vector.load %arg2[%c0_13, %c0_14, %c0_15, %c0_16] : memref<1x1x16x384xbf16, #tpu.memory_space<vmem>>, vector<1x1x16x384xbf16>
    %15 = vector.shape_cast %14 : vector<1x1x16x384xbf16> to vector<16x384xbf16>
    %16 = vector.extract_strided_slice %15 {offsets = [0, 98], sizes = [16, 128], strides = [1, 1]} : vector<16x384xbf16> to vector<16x128xbf16>
    %c2 = arith.constant 2 : index
    %c0_17 = arith.constant 0 : index
    %17 = vector.load %arg5[%c2, %c0_17] : memref<18x128xbf16, #tpu.memory_space<vmem>>, vector<1x128xbf16>
    %18 = vector.broadcast %17 : vector<1x128xbf16> to vector<16x128xbf16>
    %19 = arith.mulf %16, %18 : vector<16x128xbf16>
    %c32 = arith.constant 32 : index
    %c0_18 = arith.constant 0 : index
    %20 = vector.load %arg7[%c32, %c0_18] : memref<288x128xbf16, #tpu.memory_space<vmem>>, vector<16x128xbf16>
    tpu.vector_store %arg7[%c32, %c0_18], %19 {strides = array<i32>} : memref<288x128xbf16, #tpu.memory_space<vmem>>, vector<16x128xbf16>,
    %c0_19 = arith.constant 0 : index
    %c0_20 = arith.constant 0 : index
    %c0_21 = arith.constant 0 : index
    %c0_22 = arith.constant 0 : index
    %21 = vector.load %arg2[%c0_19, %c0_20, %c0_21, %c0_22] : memref<1x1x16x384xbf16, #tpu.memory_space<vmem>>, vector<1x1x16x384xbf16>
    %22 = vector.shape_cast %21 : vector<1x1x16x384xbf16> to vector<16x384xbf16>
    %23 = vector.extract_strided_slice %22 {offsets = [0, 126], sizes = [16, 128], strides = [1, 1]} : vector<16x384xbf16> to vector<16x128xbf16>
    %c3 = arith.constant 3 : index
    %c0_23 = arith.constant 0 : index
    %24 = vector.load %arg5[%c3, %c0_23] : memref<18x128xbf16, #tpu.memory_space<vmem>>, vector<1x128xbf16>
    %25 = vector.broadcast %24 : vector<1x128xbf16> to vector<16x128xbf16>
    %26 = arith.mulf %23, %25 : vector<16x128xbf16>
    %c48 = arith.constant 48 : index
    %c0_24 = arith.constant 0 : index
    %27 = vector.load %arg7[%c48, %c0_24] : memref<288x128xbf16, #tpu.memory_space<vmem>>, vector<16x128xbf16>
    tpu.vector_store %arg7[%c48, %c0_24], %26 {strides = array<i32>} : memref<288x128xbf16, #tpu.memory_space<vmem>>, vector<16x128xbf16>,
    %c0_25 = arith.constant 0 : index
    %c0_26 = arith.constant 0 : index
    %c0_27 = arith.constant 0 : index
    %c0_28 = arith.constant 0 : index
    %28 = vector.load %arg2[%c0_25, %c0_26, %c0_27, %c0_28] : memref<1x1x16x384xbf16, #tpu.memory_space<vmem>>, vector<1x1x16x384xbf16>
    %29 = vector.shape_cast %28 : vector<1x1x16x384xbf16> to vector<16x384xbf16>
    %30 = vector.extract_strided_slice %29 {offsets = [0, 128], sizes = [16, 128], strides = [1, 1]} : vector<16x384xbf16> to vector<16x128xbf16>
    %c64 = arith.constant 64 : index
    %c0_29 = arith.constant 0 : index
    %31 = vector.load %arg7[%c64, %c0_29] : memref<288x128xbf16, #tpu.memory_space<vmem>>, vector<16x128xbf16>
    tpu.vector_store %arg7[%c64, %c0_29], %30 {strides = array<i32>} : memref<288x128xbf16, #tpu.memory_space<vmem>>, vector<16x128xbf16>,
    %c0_30 = arith.constant 0 : index
    %c0_31 = arith.constant 0 : index
    %c0_32 = arith.constant 0 : index
    %c0_33 = arith.constant 0 : index
    %32 = vector.load %arg2[%c0_30, %c0_31, %c0_32, %c0_33] : memref<1x1x16x384xbf16, #tpu.memory_space<vmem>>, vector<1x1x16x384xbf16>
    %33 = vector.shape_cast %32 : vector<1x1x16x384xbf16> to vector<16x384xbf16>
    %34 = vector.extract_strided_slice %33 {offsets = [0, 130], sizes = [16, 128], strides = [1, 1]} : vector<16x384xbf16> to vector<16x128xbf16>
    %c5 = arith.constant 5 : index
    %c0_34 = arith.constant 0 : index
    %35 = vector.load %arg5[%c5, %c0_34] : memref<18x128xbf16, #tpu.memory_space<vmem>>, vector<1x128xbf16>
    %36 = vector.broadcast %35 : vector<1x128xbf16> to vector<16x128xbf16>
    %37 = arith.mulf %34, %36 : vector<16x128xbf16>
    %c80 = arith.constant 80 : index
    %c0_35 = arith.constant 0 : index
    %38 = vector.load %arg7[%c80, %c0_35] : memref<288x128xbf16, #tpu.memory_space<vmem>>, vector<16x128xbf16>
    tpu.vector_store %arg7[%c80, %c0_35], %37 {strides = array<i32>} : memref<288x128xbf16, #tpu.memory_space<vmem>>, vector<16x128xbf16>,
    %c0_36 = arith.constant 0 : index
    %c0_37 = arith.constant 0 : index
    %c0_38 = arith.constant 0 : index
    %c0_39 = arith.constant 0 : index
    %39 = vector.load %arg2[%c0_36, %c0_37, %c0_38, %c0_39] : memref<1x1x16x384xbf16, #tpu.memory_space<vmem>>, vector<1x1x16x384xbf16>
    %40 = vector.shape_cast %39 : vector<1x1x16x384xbf16> to vector<16x384xbf16>
    %41 = vector.extract_strided_slice %40 {offsets = [0, 158], sizes = [16, 128], strides = [1, 1]} : vector<16x384xbf16> to vector<16x128xbf16>
    %c6 = arith.constant 6 : index
    %c0_40 = arith.constant 0 : index
    %42 = vector.load %arg5[%c6, %c0_40] : memref<18x128xbf16, #tpu.memory_space<vmem>>, vector<1x128xbf16>
    %43 = vector.broadcast %42 : vector<1x128xbf16> to vector<16x128xbf16>
    %44 = arith.mulf %41, %43 : vector<16x128xbf16>
    %c96 = arith.constant 96 : index
    %c0_41 = arith.constant 0 : index
    %45 = vector.load %arg7[%c96, %c0_41] : memref<288x128xbf16, #tpu.memory_space<vmem>>, vector<16x128xbf16>
    tpu.vector_store %arg7[%c96, %c0_41], %44 {strides = array<i32>} : memref<288x128xbf16, #tpu.memory_space<vmem>>, vector<16x128xbf16>,
    %c0_42 = arith.constant 0 : index
    %c0_43 = arith.constant 0 : index
    %c0_44 = arith.constant 0 : index
    %c0_45 = arith.constant 0 : index
    %46 = vector.load %arg2[%c0_42, %c0_43, %c0_44, %c0_45] : memref<1x1x16x384xbf16, #tpu.memory_space<vmem>>, vector<1x1x16x384xbf16>
    %47 = vector.shape_cast %46 : vector<1x1x16x384xbf16> to vector<16x384xbf16>
    %48 = vector.extract_strided_slice %47 {offsets = [0, 160], sizes = [16, 128], strides = [1, 1]} : vector<16x384xbf16> to vector<16x128xbf16>
    %c7 = arith.constant 7 : index
    %c0_46 = arith.constant 0 : index
    %49 = vector.load %arg5[%c7, %c0_46] : memref<18x128xbf16, #tpu.memory_space<vmem>>, vector<1x128xbf16>
    %50 = vector.broadcast %49 : vector<1x128xbf16> to vector<16x128xbf16>
    %51 = arith.mulf %48, %50 : vector<16x128xbf16>
    %c112 = arith.constant 112 : index
    %c0_47 = arith.constant 0 : index
    %52 = vector.load %arg7[%c112, %c0_47] : memref<288x128xbf16, #tpu.memory_space<vmem>>, vector<16x128xbf16>
    tpu.vector_store %arg7[%c112, %c0_47], %51 {strides = array<i32>} : memref<288x128xbf16, #tpu.memory_space<vmem>>, vector<16x128xbf16>,
    %c0_48 = arith.constant 0 : index
    %c0_49 = arith.constant 0 : index
    %c0_50 = arith.constant 0 : index
    %c0_51 = arith.constant 0 : index
    %53 = vector.load %arg2[%c0_48, %c0_49, %c0_50, %c0_51] : memref<1x1x16x384xbf16, #tpu.memory_space<vmem>>, vector<1x1x16x384xbf16>
    %54 = vector.shape_cast %53 : vector<1x1x16x384xbf16> to vector<16x384xbf16>
    %55 = vector.extract_strided_slice %54 {offsets = [0, 162], sizes = [16, 128], strides = [1, 1]} : vector<16x384xbf16> to vector<16x128xbf16>
    %c8 = arith.constant 8 : index
    %c0_52 = arith.constant 0 : index
    %56 = vector.load %arg5[%c8, %c0_52] : memref<18x128xbf16, #tpu.memory_space<vmem>>, vector<1x128xbf16>
    %57 = vector.broadcast %56 : vector<1x128xbf16> to vector<16x128xbf16>
    %58 = arith.mulf %55, %57 : vector<16x128xbf16>
    %c128 = arith.constant 128 : index
    %c0_53 = arith.constant 0 : index
    %59 = vector.load %arg7[%c128, %c0_53] : memref<288x128xbf16, #tpu.memory_space<vmem>>, vector<16x128xbf16>
    tpu.vector_store %arg7[%c128, %c0_53], %58 {strides = array<i32>} : memref<288x128xbf16, #tpu.memory_space<vmem>>, vector<16x128xbf16>,
    %c0_54 = arith.constant 0 : index
    %c0_55 = arith.constant 0 : index
    %c0_56 = arith.constant 0 : index
    %c0_57 = arith.constant 0 : index
    %60 = vector.load %arg2[%c0_54, %c0_55, %c0_56, %c0_57] : memref<1x1x16x384xbf16, #tpu.memory_space<vmem>>, vector<1x1x16x384xbf16>
    %61 = vector.shape_cast %60 : vector<1x1x16x384xbf16> to vector<16x384xbf16>
    %62 = vector.extract_strided_slice %61 {offsets = [0, 60], sizes = [16, 128], strides = [1, 1]} : vector<16x384xbf16> to vector<16x128xbf16>
    %c9 = arith.constant 9 : index
    %c0_58 = arith.constant 0 : index
    %63 = vector.load %arg5[%c9, %c0_58] : memref<18x128xbf16, #tpu.memory_space<vmem>>, vector<1x128xbf16>
    %64 = vector.broadcast %63 : vector<1x128xbf16> to vector<16x128xbf16>
    %65 = arith.mulf %62, %64 : vector<16x128xbf16>
    %c144 = arith.constant 144 : index
    %c0_59 = arith.constant 0 : index
    %66 = vector.load %arg7[%c144, %c0_59] : memref<288x128xbf16, #tpu.memory_space<vmem>>, vector<16x128xbf16>
    tpu.vector_store %arg7[%c144, %c0_59], %65 {strides = array<i32>} : memref<288x128xbf16, #tpu.memory_space<vmem>>, vector<16x128xbf16>,
    %c0_60 = arith.constant 0 : index
    %c0_61 = arith.constant 0 : index
    %c0_62 = arith.constant 0 : index
    %c0_63 = arith.constant 0 : index
    %67 = vector.load %arg2[%c0_60, %c0_61, %c0_62, %c0_63] : memref<1x1x16x384xbf16, #tpu.memory_space<vmem>>, vector<1x1x16x384xbf16>
    %68 = vector.shape_cast %67 : vector<1x1x16x384xbf16> to vector<16x384xbf16>
    %69 = vector.extract_strided_slice %68 {offsets = [0, 64], sizes = [16, 128], strides = [1, 1]} : vector<16x384xbf16> to vector<16x128xbf16>
    %c10 = arith.constant 10 : index
    %c0_64 = arith.constant 0 : index
    %70 = vector.load %arg5[%c10, %c0_64] : memref<18x128xbf16, #tpu.memory_space<vmem>>, vector<1x128xbf16>
    %71 = vector.broadcast %70 : vector<1x128xbf16> to vector<16x128xbf16>
    %72 = arith.mulf %69, %71 : vector<16x128xbf16>
    %c160 = arith.constant 160 : index
    %c0_65 = arith.constant 0 : index
    %73 = vector.load %arg7[%c160, %c0_65] : memref<288x128xbf16, #tpu.memory_space<vmem>>, vector<16x128xbf16>
    tpu.vector_store %arg7[%c160, %c0_65], %72 {strides = array<i32>} : memref<288x128xbf16, #tpu.memory_space<vmem>>, vector<16x128xbf16>,
    %c0_66 = arith.constant 0 : index
    %c0_67 = arith.constant 0 : index
    %c0_68 = arith.constant 0 : index
    %c0_69 = arith.constant 0 : index
    %74 = vector.load %arg2[%c0_66, %c0_67, %c0_68, %c0_69] : memref<1x1x16x384xbf16, #tpu.memory_space<vmem>>, vector<1x1x16x384xbf16>
    %75 = vector.shape_cast %74 : vector<1x1x16x384xbf16> to vector<16x384xbf16>
    %76 = vector.extract_strided_slice %75 {offsets = [0, 68], sizes = [16, 128], strides = [1, 1]} : vector<16x384xbf16> to vector<16x128xbf16>
    %c11 = arith.constant 11 : index
    %c0_70 = arith.constant 0 : index
    %77 = vector.load %arg5[%c11, %c0_70] : memref<18x128xbf16, #tpu.memory_space<vmem>>, vector<1x128xbf16>
    %78 = vector.broadcast %77 : vector<1x128xbf16> to vector<16x128xbf16>
    %79 = arith.mulf %76, %78 : vector<16x128xbf16>
    %c176 = arith.constant 176 : index
    %c0_71 = arith.constant 0 : index
    %80 = vector.load %arg7[%c176, %c0_71] : memref<288x128xbf16, #tpu.memory_space<vmem>>, vector<16x128xbf16>
    tpu.vector_store %arg7[%c176, %c0_71], %79 {strides = array<i32>} : memref<288x128xbf16, #tpu.memory_space<vmem>>, vector<16x128xbf16>,
    %c0_72 = arith.constant 0 : index
    %c0_73 = arith.constant 0 : index
    %c0_74 = arith.constant 0 : index
    %c0_75 = arith.constant 0 : index
    %81 = vector.load %arg2[%c0_72, %c0_73, %c0_74, %c0_75] : memref<1x1x16x384xbf16, #tpu.memory_space<vmem>>, vector<1x1x16x384xbf16>
    %82 = vector.shape_cast %81 : vector<1x1x16x384xbf16> to vector<16x384xbf16>
    %83 = vector.extract_strided_slice %82 {offsets = [0, 124], sizes = [16, 128], strides = [1, 1]} : vector<16x384xbf16> to vector<16x128xbf16>
    %c12 = arith.constant 12 : index
    %c0_76 = arith.constant 0 : index
    %84 = vector.load %arg5[%c12, %c0_76] : memref<18x128xbf16, #tpu.memory_space<vmem>>, vector<1x128xbf16>
    %85 = vector.broadcast %84 : vector<1x128xbf16> to vector<16x128xbf16>
    %86 = arith.mulf %83, %85 : vector<16x128xbf16>
    %c192 = arith.constant 192 : index
    %c0_77 = arith.constant 0 : index
    %87 = vector.load %arg7[%c192, %c0_77] : memref<288x128xbf16, #tpu.memory_space<vmem>>, vector<16x128xbf16>
    tpu.vector_store %arg7[%c192, %c0_77], %86 {strides = array<i32>} : memref<288x128xbf16, #tpu.memory_space<vmem>>, vector<16x128xbf16>,
    %c0_78 = arith.constant 0 : index
    %c0_79 = arith.constant 0 : index
    %c0_80 = arith.constant 0 : index
    %c0_81 = arith.constant 0 : index
    %88 = vector.load %arg2[%c0_78, %c0_79, %c0_80, %c0_81] : memref<1x1x16x384xbf16, #tpu.memory_space<vmem>>, vector<1x1x16x384xbf16>
    %89 = vector.shape_cast %88 : vector<1x1x16x384xbf16> to vector<16x384xbf16>
    %90 = vector.extract_strided_slice %89 {offsets = [0, 128], sizes = [16, 128], strides = [1, 1]} : vector<16x384xbf16> to vector<16x128xbf16>
    %c208 = arith.constant 208 : index
    %c0_82 = arith.constant 0 : index
    %91 = vector.load %arg7[%c208, %c0_82] : memref<288x128xbf16, #tpu.memory_space<vmem>>, vector<16x128xbf16>
    tpu.vector_store %arg7[%c208, %c0_82], %90 {strides = array<i32>} : memref<288x128xbf16, #tpu.memory_space<vmem>>, vector<16x128xbf16>,
    %c0_83 = arith.constant 0 : index
    %c0_84 = arith.constant 0 : index
    %c0_85 = arith.constant 0 : index
    %c0_86 = arith.constant 0 : index
    %92 = vector.load %arg2[%c0_83, %c0_84, %c0_85, %c0_86] : memref<1x1x16x384xbf16, #tpu.memory_space<vmem>>, vector<1x1x16x384xbf16>
    %93 = vector.shape_cast %92 : vector<1x1x16x384xbf16> to vector<16x384xbf16>
    %94 = vector.extract_strided_slice %93 {offsets = [0, 132], sizes = [16, 128], strides = [1, 1]} : vector<16x384xbf16> to vector<16x128xbf16>
    %c14 = arith.constant 14 : index
    %c0_87 = arith.constant 0 : index
    %95 = vector.load %arg5[%c14, %c0_87] : memref<18x128xbf16, #tpu.memory_space<vmem>>, vector<1x128xbf16>
    %96 = vector.broadcast %95 : vector<1x128xbf16> to vector<16x128xbf16>
    %97 = arith.mulf %94, %96 : vector<16x128xbf16>
    %c224 = arith.constant 224 : index
    %c0_88 = arith.constant 0 : index
    %98 = vector.load %arg7[%c224, %c0_88] : memref<288x128xbf16, #tpu.memory_space<vmem>>, vector<16x128xbf16>
    tpu.vector_store %arg7[%c224, %c0_88], %97 {strides = array<i32>} : memref<288x128xbf16, #tpu.memory_space<vmem>>, vector<16x128xbf16>,
    %c0_89 = arith.constant 0 : index
    %c0_90 = arith.constant 0 : index
    %c0_91 = arith.constant 0 : index
    %c0_92 = arith.constant 0 : index
    %99 = vector.load %arg2[%c0_89, %c0_90, %c0_91, %c0_92] : memref<1x1x16x384xbf16, #tpu.memory_space<vmem>>, vector<1x1x16x384xbf16>
    %100 = vector.shape_cast %99 : vector<1x1x16x384xbf16> to vector<16x384xbf16>
    %101 = vector.extract_strided_slice %100 {offsets = [0, 188], sizes = [16, 128], strides = [1, 1]} : vector<16x384xbf16> to vector<16x128xbf16>
    %c15 = arith.constant 15 : index
    %c0_93 = arith.constant 0 : index
    %102 = vector.load %arg5[%c15, %c0_93] : memref<18x128xbf16, #tpu.memory_space<vmem>>, vector<1x128xbf16>
    %103 = vector.broadcast %102 : vector<1x128xbf16> to vector<16x128xbf16>
    %104 = arith.mulf %101, %103 : vector<16x128xbf16>
    %c240 = arith.constant 240 : index
    %c0_94 = arith.constant 0 : index
    %105 = vector.load %arg7[%c240, %c0_94] : memref<288x128xbf16, #tpu.memory_space<vmem>>, vector<16x128xbf16>
    tpu.vector_store %arg7[%c240, %c0_94], %104 {strides = array<i32>} : memref<288x128xbf16, #tpu.memory_space<vmem>>, vector<16x128xbf16>,
    %c0_95 = arith.constant 0 : index
    %c0_96 = arith.constant 0 : index
    %c0_97 = arith.constant 0 : index
    %c0_98 = arith.constant 0 : index
    %106 = vector.load %arg2[%c0_95, %c0_96, %c0_97, %c0_98] : memref<1x1x16x384xbf16, #tpu.memory_space<vmem>>, vector<1x1x16x384xbf16>
    %107 = vector.shape_cast %106 : vector<1x1x16x384xbf16> to vector<16x384xbf16>
    %108 = vector.extract_strided_slice %107 {offsets = [0, 192], sizes = [16, 128], strides = [1, 1]} : vector<16x384xbf16> to vector<16x128xbf16>
    %c16_99 = arith.constant 16 : index
    %c0_100 = arith.constant 0 : index
    %109 = vector.load %arg5[%c16_99, %c0_100] : memref<18x128xbf16, #tpu.memory_space<vmem>>, vector<1x128xbf16>
    %110 = vector.broadcast %109 : vector<1x128xbf16> to vector<16x128xbf16>
    %111 = arith.mulf %108, %110 : vector<16x128xbf16>
    %c256 = arith.constant 256 : index
    %c0_101 = arith.constant 0 : index
    %112 = vector.load %arg7[%c256, %c0_101] : memref<288x128xbf16, #tpu.memory_space<vmem>>, vector<16x128xbf16>
    tpu.vector_store %arg7[%c256, %c0_101], %111 {strides = array<i32>} : memref<288x128xbf16, #tpu.memory_space<vmem>>, vector<16x128xbf16>,
    %c0_102 = arith.constant 0 : index
    %c0_103 = arith.constant 0 : index
    %c0_104 = arith.constant 0 : index
    %c0_105 = arith.constant 0 : index
    %113 = vector.load %arg2[%c0_102, %c0_103, %c0_104, %c0_105] : memref<1x1x16x384xbf16, #tpu.memory_space<vmem>>, vector<1x1x16x384xbf16>
    %114 = vector.shape_cast %113 : vector<1x1x16x384xbf16> to vector<16x384xbf16>
    %115 = vector.extract_strided_slice %114 {offsets = [0, 196], sizes = [16, 128], strides = [1, 1]} : vector<16x384xbf16> to vector<16x128xbf16>
    %c17 = arith.constant 17 : index
    %c0_106 = arith.constant 0 : index
    %116 = vector.load %arg5[%c17, %c0_106] : memref<18x128xbf16, #tpu.memory_space<vmem>>, vector<1x128xbf16>
    %117 = vector.broadcast %116 : vector<1x128xbf16> to vector<16x128xbf16>
    %118 = arith.mulf %115, %117 : vector<16x128xbf16>
    %c272 = arith.constant 272 : index
    %c0_107 = arith.constant 0 : index
    %119 = vector.load %arg7[%c272, %c0_107] : memref<288x128xbf16, #tpu.memory_space<vmem>>, vector<16x128xbf16>
    tpu.vector_store %arg7[%c272, %c0_107], %118 {strides = array<i32>} : memref<288x128xbf16, #tpu.memory_space<vmem>>, vector<16x128xbf16>,
    %c0_108 = arith.constant 0 : index
    %c0_109 = arith.constant 0 : index
    %120 = vector.load %arg3[%c0_108, %c0_109] : memref<8x288xbf16, #tpu.memory_space<vmem>>, vector<8x288xbf16>
    %c0_110 = arith.constant 0 : index
    %c0_111 = arith.constant 0 : index
    %121 = vector.load %arg7[%c0_110, %c0_111] : memref<288x128xbf16, #tpu.memory_space<vmem>>, vector<288x128xbf16>
    %cst = arith.constant dense<0.000000e+00> : vector<8x128xf32>
    %122 = tpu.matmul %120, %121, %cst {dimension_numbers = #tpu.dot_dimension_numbers<[1], [0], [0], [1], [0, 0, 1, 1], [], []>} : vector<8x288xbf16>, vector<288x128xbf16>, vector<8x128xf32> -> vector<8x128xf32>
    %c0_112 = arith.constant 0 : index
    %c0_113 = arith.constant 0 : index
    %123 = vector.load %arg4[%c0_112, %c0_113] : memref<8x1xf32, #tpu.memory_space<vmem>>, vector<8x1xf32>
    %124 = vector.broadcast %123 : vector<8x1xf32> to vector<8x128xf32>
    %125 = arith.addf %122, %124 : vector<8x128xf32>
    %c0_114 = arith.constant 0 : index
    %c0_115 = arith.constant 0 : index
    %c0_116 = arith.constant 0 : index
    %126 = vector.load %arg6[%c0_114, %c0_115, %c0_116] : memref<1x8x128xf32, #tpu.memory_space<vmem>>, vector<1x8x128xf32>
    %127 = vector.shape_cast %126 : vector<1x8x128xf32> to vector<8x128xf32>
    %128 = vector.shape_cast %125 : vector<8x128xf32> to vector<1x8x128xf32>
    tpu.vector_store %arg6[%c0_114, %c0_115, %c0_116], %128 {strides = array<i32>} : memref<1x8x128xf32, #tpu.memory_space<vmem>>, vector<1x8x128xf32>,
    return
  }
  func.func @transform_0(%arg0: i32, %arg1: i32) -> (i32, i32, i32, i32) {
    %c0_i32 = arith.constant 0 : i32
    %c0_i32_0 = arith.constant 0 : i32
    %c0_i32_1 = arith.constant 0 : i32
    return %arg0, %arg1, %c0_i32, %c0_i32_0 : i32, i32, i32, i32
  }
  func.func @transform_1(%arg0: i32, %arg1: i32) -> (i32, i32) {
    %c0_i32 = arith.constant 0 : i32
    %c0_i32_0 = arith.constant 0 : i32
    %c0_i32_1 = arith.constant 0 : i32
    return %c0_i32, %c0_i32_0 : i32, i32
  }
  func.func @transform_2(%arg0: i32, %arg1: i32) -> (i32, i32) {
    %c0_i32 = arith.constant 0 : i32
    %c0_i32_0 = arith.constant 0 : i32
    %c0_i32_1 = arith.constant 0 : i32
    return %c0_i32, %c0_i32_0 : i32, i32
  }
  func.func @transform_3(%arg0: i32, %arg1: i32) -> (i32, i32) {
    %c0_i32 = arith.constant 0 : i32
    %c0_i32_0 = arith.constant 0 : i32
    return %c0_i32, %arg1 : i32, i32
  }
  func.func @transform_4(%arg0: i32, %arg1: i32) -> (i32, i32, i32) {
    %c0_i32 = arith.constant 0 : i32
    %c0_i32_0 = arith.constant 0 : i32
    return %arg0, %c0_i32, %arg1 : i32, i32, i32
  }
}

</mosaic_0001>

<bundles_post_ra>
// kernel: tpu_custom_call.1
= control target key start
LH: loop header
LB: loop body
LE: loop exit
PB: predicated region body
PF: predicated region fallthrough
CT: control target
= control target key end

     0   :  { %s2327_s0 = inlined_call_operand.hbm [shape: bf16[2,2,16,384], index: 0, kind: input, shape index: {}]   ;;  %s2328_s1 = inlined_call_operand.hbm [shape: bf16[8,288], index: 1, kind: input, shape index: {}]   ;;  %s2329_s2 = inlined_call_operand.vmem [shape: f32[8,1], index: 2, kind: input, shape index: {}]   ;;  %s2330_s3 = inlined_call_operand.hbm [shape: bf16[18,256], index: 3, kind: input, shape index: {}]   ;;  %s2331_s4 = inlined_call_operand.hbm [shape: f32[2,8,256], index: 4, kind: output, shape index: {}]  }
   0x1   :  { %2340 = sst [smem:[#allocation18_spill]] %s2327_s0 }
   0x2   :  { %2341 = sst [smem:[#allocation19_spill]] %s2329_s2 }
   0x3   :  { %2342 = sst [smem:[#allocation20_spill]] %s2331_s4 }
   0x4   :  { %9 = vsyncpa [#allocation4], 0 }
   0x5   :  { %11 = vsyncpa [#allocation4 + $0x1], 0 }
   0x6   :  { %12 = vsyncpa [#allocation7], 0 }
   0x7   :  { %13 = vsyncpa [#allocation5], 0 }
   0x8   :  { %15 = vsyncpa [#allocation5 + $0x1], 0  ;;  %s1851_s15 = smov 0   ;;  %s1853_s16 = smov 0  }
   0x9   :  { %s1855_s17 = smov 0   ;;  %s1857_s18 = smov 0  }
   0xa   :  { %s1859_s19 = smov 0   ;;  %s1861_s20 = smov 0  }
   0xb   :  { %s1863_s21 = smov 0   ;;  %s1865_s22 = smov 0  }
   0xc   :  { %s1867_s23 = smov 0   ;;  %s1869_s24 = smov 0  }
   0xd   :  { %s1871_s25 = smov 0  }
   0xe LB: > { %2343 = sst [smem:[#allocation14_spill]] %s1783_s21  ;;  %s30_s26 = sadd.s32 1, %s1791_s23  ;;  %s1799_s25 = sphi %s1871_s25, %s21_s25   ;;  %s1795_s24 = sphi %s1869_s24, %s2379_s24   ;;  %s1791_s23 = sphi %s1867_s23, %s2378_s23   ;;  %s1787_s22 = sphi %s1865_s22, %s2377_s22   ;;  %s1783_s21 = sphi %s1863_s21, %s2376_s21   ;;  %s1779_s20 = sphi %s1861_s20, %s2375_s20   ;;  %s1775_s19 = sphi %s1859_s19, %s2374_s19   ;;  %s1771_s18 = sphi %s1857_s18, %s2373_s18   ;;  %s1767_s17 = sphi %s1855_s17, %s2372_s17   ;;  %s1763_s16 = sphi %s1853_s16, %s2371_s16   ;;  %s1759_s15 = sphi %s1851_s15, %s2370_s15  }
   0xf   : > { %2344 = sst [smem:[#allocation15_spill]] %s1787_s22  ;;  %s33_s27 = sadd.s32 1, %s1795_s24 }
  0x10   : > { %p31_p0 = scmp.ge.s32.totalorder %s30_s26, 2  ;;  %s42_s28 = sadd.s32 1, %s1779_s20 }
  0x11   : > { %p49_p1 = scmp.ne.s32.totalorder %s1779_s20, %s1775_s19  ;;  %p50_p2 = scmp.eq.s32.totalorder %s1799_s25, 0 }
  0x12   : > { %s2381_s26 = smov (%p31_p0, %s30_s26), 0  ;;  %s2383_s27 = smov (!%p31_p0, %s33_s27), %s1795_s24 }
  0x13   : > { %2345 = sst [smem:[#allocation16_spill]] %s2381_s26  ;;  %s1917_s29 = ssub.s32 %s1791_s23, %s2381_s26 }
  0x14   : > { %p1924_p3 = por %p50_p2, %p49_p1  ;;  %p35_p4 = scmp.ge.s32.totalorder %s2383_s27, 2 }
  0x15   : > { %p108_p5 = scmp.eq.s32.totalorder %s1917_s29, 0  ;;  %p2335_p6 = scmp.lt.s32.totalorder %s1799_s25, 4 }
  0x16   : > { %s2385_s27 = smov (%p35_p4, %s2383_s27), 0  ;;  %s189_s5 = sand.u32 1, %s1799_s25  }
  0x17   : > { %2347 = sst [smem:[#allocation17_spill]] %s2385_s27  ;;  %s191_s6 = sand.u32 1, %s1779_s20  }
  0x18   : > { %s37_s7 = ssub.s32 %s1795_s24, %s2385_s27  ;;  %s1422_s9 = smul.u32 24, %s191_s6 }
  0x19   : > { %s39_s8 = sor.u32 %s1917_s29, %s37_s7  ;;  %s1423_s10 = smul.u32 6, %s1791_s23 }
  0x1a   : > { %p40_p7 = scmp.eq.s32.totalorder %s39_s8, 0  ;;  %s1424_s11 = smul.u32 12, %s1795_s24 }
  0x1b   : > { %s193_s14 = scalar_lea.vmem [#allocation3], %s1422_s9  ;;  %s2348_s0 = sld [smem:[#allocation18_spill]] }
  0x1c   : > { %s1940_s12 = scalar_select %p40_p7, %s1779_s20, %s42_s28  }
  0x1d   : > { %s199_s13 = sadd.s32 %s1424_s11, %s1423_s10  ;;  %s202_s26 = sshll.u32 %s193_s14, 4  ;;  %s203_s26 = int_to_ptr.vmem [resolvable:$true] %s202_s26 }
  0x1e   : > { %s1285_s4 = sshll.u32 %s199_s13, 6  ;;  %p1949_p8 = pnand %p2335_p6, %p1924_p3 }
  0x1f   : > { %s1953_s6 = scalar_lea.sflag [#allocation4], %s189_s5  ;;  %s1602_s28 = scalar_lea.vmem %s203_s26, 384 }
  0x20   : > { %p1591_p9 = pneg %p1949_p8  ;;  %p1603_p10 = scmp.ne.s32.totalorder %s203_s26, %s1602_s28 }
  0x21   : > { %s201_s2 = scalar_lea.hbm %s2348_s0, %s1285_s4  ;;  %s1801_s7 = smov [#allocation3]  }
  0x22   : > { %p1605_p11 = pnand %p1603_p10, %p1591_p9  ;;  %s1607_s8 = sshll.u32 %s1801_s7, 4  ;;  %s1608_s8 = int_to_ptr.vmem [resolvable:$false] %s1607_s8 }
  0x23   : > { %s1609_s21 = scalar_lea.vmem %s1608_s8, 768  ;;  %p1610_p13 = scmp.lt.s32.totalorder %s203_s26, %s1608_s8 }
  0x24   : > { %p1606_p12 = pneg %p1605_p11  ;;  %p1611_p0 = scmp.lt.s32.totalorder %s1609_s21, %s1602_s28 }
  0x26   : > { %p1612_p4 = por %p1611_p0, %p1610_p13 }
  0x28   : > { %p1613_p3 = pnand %p1612_p4, %p1606_p12 }
  0x2a   : > { %1616 = shalt.err (!%p1613_p3)
}
  0x2b   : > { %s1802_s4 = smov 192   ;;  %s1803_s22 = smov 12  }
  0x2c   : > { %1445 = dma.hbm_to_vmem [thread:$0]  (!%p1949_p8), %s201_s2, 384, %s203_s26, %s1953_s6, %s1802_s4, %s1802_s4, %s1803_s22  }
  0x2d   : > { %s1961_s30 = sadd.s32 4294967295, %s1799_s25   ;;  %s1281_s5 = sadd.s32 4294967294, %s1799_s25  }
  0x2e   : > { %p55_p7 = scmp.ne.s32.totalorder %s1775_s19, %s1771_s18  ;;  %p2337_p9 = scmp.eq.s32.totalorder %s1961_s30, 0 }
  0x2f   : > { %s110_s9 = sadd.s32 1, %s1767_s17  ;;  %p117_p8 = scmp.ne.s32.totalorder %s1767_s17, %s1763_s16 }
  0x30   : > { %s1971_s10 = scalar_select %p108_p5, %s1767_s17, %s110_s9  }
  0x31   : > { %p1975_p10 = por %p2337_p9, %p55_p7  ;;  %p123_p11 = scmp.ne.s32.totalorder %s1763_s16, %s1759_s15 }
  0x32   : > { %p149_p12 = scmp.eq.s32.totalorder %s1961_s30, 3  ;;  %p119_p13 = por %p117_p8, %p50_p2 }
  0x33   : > { %s2350_s27 = scalar_select %p1975_p10, 1, 0 }
  0x34   : > { %p155_p0 = scmp.eq.s32.totalorder %s1281_s5, 3  ;;  %p1988_p4 = por %p123_p11, %p2337_p9 }
  0x35   : > { %p1995_p5 = por %p149_p12, %p49_p1  ;;  %p1282_p6 = scmp.ge.s32.totalorder %s1799_s25, 1 }
  0x36   : > { %s2351_s2 = scalar_select %p1988_p4, 1, 0 }
  0x37   : > { %s2352_s26 = scalar_select %p1995_p5, 1, 0 }
  0x38   : > { %p1999_p3 = por %p155_p0, %p55_p7  ;;  %p162_p10 = scmp.lt.s32.totalorder %s1799_s25, 5 }
  0x39   : > { %p2354_p2 = scmp.lt.s32.totalorder %s1799_s25, 4  ;;  %s1804_s13 = smov [#allocation6]  }
  0x3a   : > { %s2353_s29 = scalar_select %p1999_p3, 1, 0 }
  0x3b   : > { %p2007_p8 = pnand %p2354_p2, %p119_p13  ;;  %p2011_p11 = pnand %p1282_p6, %p162_p10 }
  0x3c   : > { %s175_s14 = sshll.u32 %s1804_s13, 4  ;;  %s214_s28 = sand.u32 1, %s1767_s17   ;;  %s176_s14 = int_to_ptr.vmem [resolvable:$true] %s175_s14 }
  0x3d   : > { %p1438_p1 = pneg %p2011_p11  ;;  %s1425_s7 = smul.u32 12, %s214_s28 }
  0x3e   : > { %s1286_s8 = sshll.u32 %s1791_s23, 6  ;;  %s1628_s13 = scalar_lea.vmem %s176_s14, 192 }
  0x3f   : > { %p2021_p7 = pnand %p1438_p1, %p2337_p9  ;;  %s2028_s5 = scalar_lea.hbm %s2330_s3, %s1286_s8 }
  0x40   : > { %s216_s9 = scalar_lea.vmem [#allocation8], %s1425_s7  ;;  %p1629_p10 = scmp.ne.s32.totalorder %s176_s14, %s1628_s13 }
  0x41   : > { %s222_s0 = sshll.u32 %s216_s9, 4  ;;  %p1619_p6 = pneg %p2021_p7  ;;  %s223_s0 = int_to_ptr.vmem [resolvable:$true] %s222_s0 }
  0x42   : > { %p1636_p0 = scmp.lt.s32.totalorder %s176_s14, %s176_s14  ;;  %p1637_p2 = scmp.lt.s32.totalorder %s1628_s13, %s1628_s13 }
  0x43   : > { %p1631_p12 = pnand %p1629_p10, %p1619_p6 }
  0x44   : > { %p1638_p1 = por %p1637_p2, %p1636_p0 }
  0x45   : > { %p1632_p13 = pneg %p1631_p12 }
  0x47   : > { %p1639_p9 = pnand %p1638_p1, %p1632_p13 }
  0x49   : > { %1642 = shalt.err (!%p1639_p9)
}
  0x4a   : > { %1441 = dma.hbm_to_vmem [thread:$0]  (!%p2021_p7), %s2328_s1, 192, %s176_s14, [#allocation7]  }
  0x4b   : > { %p1645_p3 = pneg %p2007_p8  ;;  %s1656_s7 = scalar_lea.vmem %s223_s0, 192 }
  0x4c   : > { %p1657_p5 = scmp.ne.s32.totalorder %s223_s0, %s1656_s7  ;;  %s1805_s8 = smov [#allocation8]  }
  0x4d   : > { %s1661_s22 = sshll.u32 %s1805_s8, 4  ;;  %s1662_s22 = int_to_ptr.vmem [resolvable:$false] %s1661_s22 }
  0x4e   : > { %p1659_p4 = pnand %p1657_p5, %p1645_p3  ;;  %s1663_s9 = scalar_lea.vmem %s1662_s22, 384 }
  0x4f   : > { %p1664_p10 = scmp.lt.s32.totalorder %s223_s0, %s1662_s22  ;;  %p1665_p9 = scmp.lt.s32.totalorder %s1663_s9, %s1656_s7 }
  0x50   : > { %p1660_p6 = pneg %p1659_p4 }
  0x51   : > { %p1666_p12 = por %p1665_p9, %p1664_p10 }
  0x53   : > { %p1667_p13 = pnand %p1666_p12, %p1660_p6 }
  0x55   : > { %1670 = shalt.err (!%p1667_p13)
}
  0x56   : > { %s1806_s21 = smov 128   ;;  %s1807_s14 = smov 64  }
  0x57   : > { %s1808_s13 = smov 4   ;;  %234 = sbr.rel (%p2011_p11) target bundleno = 608 (0x260), region = 36 }
  0x58   : > { %1448 = dma.hbm_to_vmem [thread:$0]  (!%p2007_p8), %s2028_s5, 192, %s223_s0, %s1953_s6, %s1806_s21, %s1807_s14, %s1808_s13  }
  0x59   : > { %s236_s28 = sand.u32 (!%p2011_p11), 1, %s1961_s30   ;;  %s2047_s4 = sand.u32 (!%p2011_p11), 1, %s1775_s19  }
  0x5a   : > { %s1426_s7 = smul.u32 (!%p2011_p11), 24, %s2047_s4  ;;  %s237_s8 = scalar_lea.sflag (!%p2011_p11), [#allocation4], %s236_s28 }
  0x5b   : > { %p2358_p4 = scmp.ne.s32.totalorder (!%p2011_p11), %s2350_s27, 0 }
  0x5c   : > { %s2050_s22 = scalar_lea.vmem [#allocation3], %s1426_s7 }
  0x5d   : > { %1742 = dma.done.wait (%p2358_p4), %s237_s8, 384  }
  0x5e   : > { %1744 = vsyncadd (%p2358_p4), %s237_s8, 4294966912  ;;  %p2359_p5 = scmp.eq.s32.totalorder %s1961_s30, 0 }
  0x60   : > { %1746 = dma.done.wait (%p2359_p5), [#allocation7], 192   ;;  %p2360_p3 = pmov %p2359_p5 }
  0x61   : > { %s251_s0 = sand.u32 1, %s1763_s16   ;;  %p2361_p8 = scmp.ne.s32.totalorder %s2351_s2, 0 }
  0x62   : > { %1748 = vsyncadd (%p2360_p3), [#allocation7], 4294967104  ;;  %s1427_s6 = smul.u32 12, %s251_s0 }
  0x64   : > { %s2061_s15 = scalar_lea.vmem [#allocation8], %s1427_s6 }
  0x65   : > { %1750 = dma.done.wait (%p2361_p8), %s237_s8, 192  }
  0x66   : > { %1752 = vsyncadd (%p2361_p8), %s237_s8, 4294967104  ;;  %v290_v0 = vlaneseq  ;;  %v2071_v3 = vld [vmem:[%s2050_s22 + $0xc] sm:$0xff]  ;;  %v2074_v4 = vld [vmem:[%s2050_s22] sm:$0xff]  ;;  %s1809_s30 = smov 68   ;;  %s1810_s27 = smov 124   ;;  %v1817_v61 = vmov 0.0  }
  0x67   : > { %v703_v5 = vld [vmem:[%s2061_s15 + $0x4] sm:$0x4]  ;;  %806 = vrot.lane.b32.xlu1 %v2071_v3, %s1809_s30  ;;  %802 = vrot.lane.b32.xlu0 %v2074_v4, %s1809_s30  ;;  %v633_v8 = vld [vmem:[%s2061_s15 + $0x4] sm:$0x2]  ;;  %s1811_s2 = smov 64   ;;  %s1812_s11 = smov 98  }
  0x68   : > { %v2067_v1 = vshrl.u32 %v290_v0, 7  ;;  %v705_v7 = vpack.i.b16 %v703_v5, %v703_v5  ;;  %v359_v9 = vld [vmem:[%s2061_s15] sm:$0x2]  ;;  %v635_v11 = vpack.i.b16 %v633_v8, %v633_v8  ;;  %v286_v13 = vld [vmem:[%s2061_s15] sm:$0x1]  ;;  %s1813_s5 = smov 94   ;;  %1414 = vmatprep.subr.bf16.mxu1 %v1817_v61 }
  0x69   : > { %v361_v12 = vpack.i.b16 %v359_v9, %v359_v9  ;;  %v668_v14 = vld [vmem:[%s2061_s15 + $0x4] sm:$0x2]  ;;  %v395_v15 = vld [vmem:[%s2061_s15] sm:$0x2]  ;;  %v288_v17 = vpack.i.b16 %v286_v13, %v286_v13  ;;  %v322_v20 = vld [vmem:[%s2061_s15] sm:$0x1] }
  0x6a   : > { %v451_v2 = vsub.s32 2, %v2067_v1  ;;  %v365_v6 = vsub.s32 1, %v2067_v1  ;;  %v2085_v10 = vsub.s32 0, %v2067_v1  ;;  %v670_v18 = vshrl.u32 %v668_v14, 16  ;;  %v596_v21 = vld [vmem:[%s2061_s15 + $0x4] sm:$0x1] }
  0x6b   : > { %v397_v19 = vshrl.u32 %v395_v15, 16  ;;  %v324_v24 = vshrl.u32 %v322_v20, 16  ;;  %v598_v25 = vshrl.u32 %v596_v21, 16  ;;  %s1814_s9 = smov 126   ;;  %s1815_s21 = smov 96   ;;  %v741_v54 = vrot.slane %v2074_v4, 4 }
  0x6c   : > { %v710_v16 = vrot.slane %v705_v7, %v451_v2  ;;  %v640_v22 = vrot.slane %v635_v11, %v365_v6  ;;  %v366_v23 = vrot.slane %v361_v12, %v365_v6  ;;  %v293_v27 = vrot.slane %v288_v17, %v2085_v10  ;;  %s1816_s14 = smov 60   ;;  %v786_v43 = vld [vmem:[%s2050_s22 + $0x8] sm:$0xf]  ;;  %v788_v44 = vld [vmem:[%s2050_s22 + $0x14] sm:$0xf]  ;;  %s1818_s13 = smov 4  }
  0x6d   : > { %v671_v28 = vpack.i.b16 %v670_v18, %v670_v18  ;;  %v398_v29 = vpack.i.b16 %v397_v19, %v397_v19  ;;  %v325_v33 = vpack.i.b16 %v324_v24, %v324_v24  ;;  %v599_v36 = vpack.i.b16 %v598_v25, %v598_v25  ;;  %v518_v45 = vld [vmem:[%s2050_s22 + $0x8] sm:$0xf]  ;;  %v520_v46 = vld [vmem:[%s2050_s22 + $0x14] sm:$0xf]  ;;  %745 = vst [vmem:[#allocation2 + $0x68] sm:$0xf] %v741_v54 }
  0x6e   : > { %v1301_v26 = vcombine.low %v710_v16, %v710_v16  ;;  %v1299_v30 = vcombine.low %v640_v22, %v640_v22  ;;  %v1292_v31 = vcombine.low %v366_v23, %v366_v23  ;;  %v1290_v34 = vcombine.low %v293_v27, %v293_v27  ;;  %v748_v47 = vld [vmem:[%s2050_s22 + $0x8] sm:$0xf]  ;;  %v750_v48 = vld [vmem:[%s2050_s22 + $0x14] sm:$0xf]  ;;  %438 = vst [vmem:[#allocation2 + $0x20] sm:$0xf] %v741_v54 }
  0x6f   : > { %v676_v32 = vrot.slane %v671_v28, %v365_v6  ;;  %v403_v35 = vrot.slane %v398_v29, %v365_v6  ;;  %v330_v38 = vrot.slane %v325_v33, %v2085_v10  ;;  %v604_v40 = vrot.slane %v599_v36, %v2085_v10  ;;  %v480_v49 = vld [vmem:[%s2050_s22 + $0x8] sm:$0xf]  ;;  %v482_v50 = vld [vmem:[%s2050_s22 + $0x14] sm:$0xf]  ;;  %v521_v16 = vld [vmem:[%s2061_s15] sm:$0x8] }
  0x70   : > { %714 = vrot.lane.b32.xlu0 %v1301_v26, %s1810_s27  ;;  %644 = vrot.lane.b32.xlu1 %v1299_v30, %s1811_s2  ;;  %v441_v51 = vld [vmem:[%s2050_s22 + $0x8] sm:$0xf]  ;;  %v443_v52 = vld [vmem:[%s2050_s22 + $0x14] sm:$0xf]  ;;  %v742_v55 = vrot.slane %v2071_v3, 4  ;;  %vm717_vm0 = vcmask 1014784  }
  0x71   : > { %v1300_v37 = vcombine.low %v676_v32, %v676_v32  ;;  %v1293_v39 = vcombine.low %v403_v35, %v403_v35  ;;  %v1291_v41 = vcombine.low %v330_v38, %v330_v38  ;;  %v1298_v42 = vcombine.low %v604_v40, %v604_v40  ;;  %v557_v53 = vld [vmem:[%s2050_s22 + $0x8] sm:$0xf]  ;;  %v559_v56 = vld [vmem:[%s2050_s22 + $0x14] sm:$0xf]  ;;  %s1819_s28 = smov 30   ;;  %s1820_s7 = smov 34  }
  0x72   : > { %746 = vst [vmem:[#allocation2 + $0x6c] sm:$0xf] %v742_v55  ;;  %439 = vst [vmem:[#allocation2 + $0x24] sm:$0xf] %v742_v55  ;;  %v863_v57 = vld [vmem:[%s2050_s22 + $0x8] sm:$0xf] }
  0x73   : > { %v865_v58 = vld [vmem:[%s2050_s22 + $0x14] sm:$0xf]  ;;  %vm647_vm1 = vcmask 523264   ;;  %vm373_vm2 = vcmask 801792   ;;  %vm300_vm3 = vcmask 769024   ;;  %v2171_v23 = vsub.s32 3, %v2067_v1 }
  0x74   : > { %370 = vrot.lane.b32.xlu0 %v1292_v31, %s1812_s11  ;;  %297 = vrot.lane.b32.xlu1 %v1290_v34, %s1813_s5  ;;  %v789_v7 = vld [vmem:[%s2061_s15 + $0x4] sm:$0x8]  ;;  %v523_v25 = vshrl.u32 %v521_v16, 16  ;;  %vm624_vm4 = vcmask 556032   ;;  %vm410_vm5 = vcmask 1031168   ;;  %vm611_vm6 = vcmask 490496  }
  0x75   : > { %v791_v15 = vshrl.u32 %v789_v7, 16  ;;  %vm337_vm7 = vcmask 785408   ;;  %s1821_s8 = smov 2   ;;  %s1822_s0 = smov 32   ;;  %vm1823_vm8 = vmmov 0   ;;  %v1824_v1 = vmov 0  }
  0x76   : > { %v524_v33 = vpack.i.b16 %v523_v25, %v523_v25  ;;  %1418 = vmatprep.mubr.msk.bf16.mxu1 %vm1823_vm8, %v1817_v61  ;;  %1567 = vset.pattern.permute.xlu0 %v1824_v1  ;;  %vm730_vm9 = vcmask 31744   ;;  %vm386_vm10 = vcmask 244736   ;;  %vm313_vm11 = vcmask 277504   ;;  %p2366_p7 = scmp.ne.s32.totalorder %s2352_s26, 0  ;;  %s1825_s6 = smov [#allocation9]  }
  0x77   : > { %v792_v24 = vpack.i.b16 %v791_v15, %v791_v15  ;;  %vm423_vm12 = vcmask 15360   ;;  %vm350_vm13 = vcmask 261120  }
  0x78   : > { %680 = vrot.lane.b32.xlu0 %v1300_v37, %s1809_s30  ;;  %407 = vrot.lane.b32.xlu1 %v1293_v39, %s1814_s9 }
  0x79   : > { %v797_v32 = vrot.slane %v792_v24, %v2171_v23 }
  0x7b   : > { %v1303_v40 = vcombine.low %v797_v32, %v797_v32 }
  0x7c   : > { %334 = vrot.lane.b32.xlu0 %v1291_v41, %s1815_s21  ;;  %608 = vrot.lane.b32.xlu1 %v1298_v42, %s1816_s14  ;;  %v529_v41 = vrot.slane %v524_v33, %v2171_v23 }
  0x7e   : > { %v1296_v55 = vcombine.low %v529_v41, %v529_v41 }
  0x80   : > { %534 = vrot.lane.b32.xlu0 %v2074_v4, %s1815_s21  ;;  %538 = vrot.lane.b32.xlu1 %v2071_v3, %s1815_s21 }
  0x84   : > { %804 = vrot.lane.b32.xlu0 %v786_v43, %s1809_s30  ;;  %808 = vrot.lane.b32.xlu1 %v788_v44, %s1809_s30 }
  0x88   : > { %536 = vrot.lane.b32.xlu0 %v518_v45, %s1815_s21  ;;  %540 = vrot.lane.b32.xlu1 %v520_v46, %s1815_s21 }
  0x8c   : > { %763 = vrot.lane.b32.xlu0 %v2074_v4, %s1810_s27  ;;  %767 = vrot.lane.b32.xlu1 %v2071_v3, %s1810_s27 }
  0x90   : > { %495 = vrot.lane.b32.xlu0 %v2074_v4, %s1812_s11  ;;  %499 = vrot.lane.b32.xlu1 %v2071_v3, %s1812_s11 }
  0x94   : > { %765 = vrot.lane.b32.xlu0 %v748_v47, %s1810_s27  ;;  %769 = vrot.lane.b32.xlu1 %v750_v48, %s1810_s27  ;;  %s2364_s27 = sld [smem:[#allocation14_spill]] }
  0x98   : > { %497 = vrot.lane.b32.xlu0 %v480_v49, %s1812_s11  ;;  %501 = vrot.lane.b32.xlu1 %v482_v50, %s1812_s11 }
  0x9c   : > { %457 = vrot.lane.b32.xlu0 %v2074_v4, %s1814_s9  ;;  %461 = vrot.lane.b32.xlu1 %v2071_v3, %s1814_s9 }
  0xa0   : > { %459 = vrot.lane.b32.xlu0 %v441_v51, %s1814_s9  ;;  %463 = vrot.lane.b32.xlu1 %v443_v52, %s1814_s9 }
  0xa4   : > { %572 = vrot.lane.b32.xlu0 %v2074_v4, %s1813_s5  ;;  %576 = vrot.lane.b32.xlu1 %v2071_v3, %s1813_s5 }
  0xa8   : > { %879 = vrot.lane.b32.xlu0 %v2074_v4, %s1816_s14  ;;  %883 = vrot.lane.b32.xlu1 %v2071_v3, %s1816_s14 }
  0xac   : > { %574 = vrot.lane.b32.xlu0 %v557_v53, %s1813_s5  ;;  %578 = vrot.lane.b32.xlu1 %v559_v56, %s1813_s5 }
  0xb0   : > { %881 = vrot.lane.b32.xlu0 %v863_v57, %s1816_s14  ;;  %885 = vrot.lane.b32.xlu1 %v865_v58, %s1816_s14  ;;  %v751_v57 = vld [vmem:[%s2061_s15 + $0x4] sm:$0x8] }
  0xd9   : > { %v2154_v59 = vpop.permute.xlu0 %802  ;;  %v2156_v60 = vpop.permute.xlu1 %806 }
  0xda   : > { %v810_v42 = vrot.slane %v2154_v59, 4  ;;  %v811_v43 = vrot.slane %v2156_v60, 4 }
  0xe2   : > { %v715_v62 = vpop.permute.xlu0 %714  ;;  %v645_v0 = vpop.permute.xlu1 %644 }
  0xe3   : > { %v716_v63 = vrot.slane %v715_v62, 4  ;;  %v646_v5 = vrot.slane %v645_v0, 4 }
  0xe5   : > { %v718_v6 = vsel %vm717_vm0, %v716_v63, %v715_v62  ;;  %v648_v12 = vsel %vm647_vm1, %v646_v5, %v645_v0 }
  0xe6   : > { %v720_v8 = vmul.bf16 %v2074_v4, %v718_v6  ;;  %v721_v9 = vmul.bf16 %v2071_v3, %v718_v6  ;;  %v371_v11 = vpop.permute.xlu0 %370  ;;  %v298_v14 = vpop.permute.xlu1 %297  ;;  %v650_v17 = vmul.bf16 %v2074_v4, %v648_v12  ;;  %v651_v18 = vmul.bf16 %v2071_v3, %v648_v12 }
  0xe7   : > { %v372_v13 = vrot.slane %v371_v11, 4  ;;  %v299_v21 = vrot.slane %v298_v14, 4 }
  0xe8   : > { %724 = vrot.lane.b32.xlu0 %v720_v8, %s1818_s13  ;;  %726 = vrot.lane.b32.xlu1 %v721_v9, %s1818_s13  ;;  %v753_v9 = vpack.i.b16 %v751_v57, %v751_v57 }
  0xe9   : > { %v374_v20 = vsel %vm373_vm2, %v372_v13, %v371_v11  ;;  %v301_v29 = vsel %vm300_vm3, %v299_v21, %v298_v14  ;;  %v483_v11 = vld [vmem:[%s2061_s15] sm:$0x8]  ;;  %v444_v21 = vld [vmem:[%s2061_s15] sm:$0x4] }
  0xea   : > { %v681_v19 = vpop.permute.xlu0 %680  ;;  %v408_v22 = vpop.permute.xlu1 %407  ;;  %v376_v26 = vmul.bf16 %v2074_v4, %v374_v20  ;;  %v377_v27 = vmul.bf16 %v2071_v3, %v374_v20  ;;  %v303_v34 = vmul.bf16 %v2074_v4, %v301_v29  ;;  %v304_v35 = vmul.bf16 %v2071_v3, %v301_v29 }
  0xeb   : > { %v682_v30 = vrot.slane %v681_v19, 4  ;;  %v409_v38 = vrot.slane %v408_v22, 4  ;;  %v758_v20 = vrot.slane %v753_v9, %v2171_v23  ;;  %v446_v29 = vshrl.u32 %v444_v21, 16 }
  0xec   : > { %654 = vrot.lane.b32.xlu0 %v650_v17, %s1811_s2  ;;  %656 = vrot.lane.b32.xlu1 %v651_v18, %s1811_s2 }
  0xed   : > { %v683_v37 = vsel %vm624_vm4, %v682_v30, %v681_v19  ;;  %v411_v47 = vsel %vm410_vm5, %v409_v38, %v408_v22  ;;  %v485_v19 = vpack.i.b16 %v483_v11, %v483_v11  ;;  %v1302_v32 = vcombine.low %v758_v20, %v758_v20  ;;  %v2212_v38 = vld [vmem:[#allocation6] sm:$0xff] }
  0xee   : > { %v2175_v28 = vpop.permute.xlu0 %334  ;;  %v609_v31 = vpop.permute.xlu1 %608  ;;  %v685_v44 = vmul.bf16 %v2074_v4, %v683_v37  ;;  %v686_v45 = vmul.bf16 %v2071_v3, %v683_v37  ;;  %v413_v58 = vmul.bf16 %v2074_v4, %v411_v47  ;;  %v414_v59 = vmul.bf16 %v2071_v3, %v411_v47 }
  0xef   : > { %v610_v48 = vrot.slane %v609_v31, 4  ;;  %v336_v62 = vrot.slane %v2175_v28, 4 }
  0xf0   : > { %380 = vrot.lane.b32.xlu0 %v376_v26, %s1819_s28  ;;  %382 = vrot.lane.b32.xlu1 %v377_v27, %s1819_s28 }
  0xf1   : > { %v612_v63 = vsel %vm611_vm6, %v610_v48, %v609_v31  ;;  %v338_v16 = vsel %vm337_vm7, %v336_v62, %v2175_v28  ;;  %v490_v28 = vrot.slane %v485_v19, %v2171_v23  ;;  %v866_v62 = vld [vmem:[%s2061_s15 + $0x8] sm:$0x1] }
  0xf2   : > { %v535_v36 = vpop.permute.xlu0 %534  ;;  %v539_v39 = vpop.permute.xlu1 %538  ;;  %v614_v13 = vmul.bf16 %v2074_v4, %v612_v63  ;;  %v615_v14 = vmul.bf16 %v2071_v3, %v612_v63  ;;  %v340_v22 = vmul.bf16 %v2074_v4, %v338_v16  ;;  %v341_v24 = vmul.bf16 %v2071_v3, %v338_v16 }
  0xf3   : > { %v542_v49 = vrot.slane %v535_v36, 4  ;;  %v543_v52 = vrot.slane %v539_v39, 4  ;;  %v1295_v37 = vcombine.low %v490_v28, %v490_v28  ;;  %v868_v9 = vshrl.u32 %v866_v62, 16 }
  0xf4   : > { %309 = vrot.lane.b32.xlu1 %v304_v35, %s1820_s7  ;;  %307 = vrot.lane.b32.xlu0 %v303_v34, %s1820_s7  ;;  %s2365_s7 = sld [smem:[#allocation20_spill]] }
  0xf6   : > { %v805_v46 = vpop.permute.xlu0 %804  ;;  %v809_v51 = vpop.permute.xlu1 %808 }
  0xf7   : > { %v812_v50 = vsel %vm624_vm4, %v810_v42, %v805_v46  ;;  %v813_v54 = vsel %vm624_vm4, %v811_v43, %v809_v51  ;;  %v447_v42 = vpack.i.b16 %v446_v29, %v446_v29  ;;  %v827_v43 = vld [vmem:[%s2050_s22 + $0x14] sm:$0xf]  ;;  %v1307_v46 = vcombine.high %v2212_v38, %v2212_v38 }
  0xf8   : > { %v820_v53 = vmul.bf16 %v1303_v40, %v812_v50  ;;  %691 = vrot.lane.b32.xlu1 %v686_v45, %s1816_s14  ;;  %689 = vrot.lane.b32.xlu0 %v685_v44, %s1816_s14  ;;  %v821_v56 = vmul.bf16 %v1303_v40, %v813_v54  ;;  %v825_v44 = vld [vmem:[%s2050_s22 + $0x8] sm:$0xf] }
  0xf9   : > { %1099 = vmatprep.mubr.bf16.mxu0 %v1307_v46  ;;  %v452_v51 = vrot.slane %v447_v42, %v451_v2 }
  0xfa   : > { %v537_v60 = vpop.permute.xlu0 %536  ;;  %v1383_v0 = vcombine.low %v820_v53, %v821_v56  ;;  %v541_v6 = vpop.permute.xlu1 %540 }
  0xfb   : > { %v544_v5 = vsel %vm337_vm7, %v542_v49, %v537_v60  ;;  %v545_v8 = vsel %vm337_vm7, %v543_v52, %v541_v6  ;;  %v560_v60 = vld [vmem:[%s2061_s15 + $0x4] sm:$0x1] }
  0xfc   : > { %419 = vrot.lane.b32.xlu1 %v414_v59, %s1821_s8  ;;  %417 = vrot.lane.b32.xlu0 %v413_v58, %s1821_s8  ;;  %v552_v7 = vmul.bf16 %v1296_v55, %v544_v5  ;;  %1384 = vst [vmem:[#allocation2 + $0x78] sm:$0xff] %v1383_v0   ;;  %v553_v12 = vmul.bf16 %v1296_v55, %v545_v8 }
  0xfd   : > { %v1294_v58 = vcombine.low %v452_v51, %v452_v51  ;;  %v562_v8 = vpack.i.b16 %v560_v60, %v560_v60 }
  0xfe   : > { %v764_v15 = vpop.permute.xlu0 %763  ;;  %v1377_v17 = vcombine.low %v552_v7, %v553_v12  ;;  %v768_v18 = vpop.permute.xlu1 %767 }
  0xff   : > { %v771_v26 = vrot.slane %v764_v15, 4  ;;  %v772_v31 = vrot.slane %v768_v18, 4  ;;  %v1572_v15 = vld [vmem:[#allocation2 + $0x68] sm:$0xff]   ;;  %v869_v18 = vpack.i.b16 %v868_v9, %v868_v9 }
 0x100   : > { %620 = vrot.lane.b32.xlu1 %v615_v14, %s1809_s30  ;;  %618 = vrot.lane.b32.xlu0 %v614_v13, %s1809_s30  ;;  %1378 = vst [vmem:[#allocation2 + $0x38] sm:$0xff] %v1377_v17   ;;  %s2362_s30 = sld [smem:[#allocation19_spill]]  ;;  %v567_v17 = vrot.slane %v562_v8, %v2085_v10 }
 0x102   : > { %v496_v25 = vpop.permute.xlu0 %495  ;;  %v500_v27 = vpop.permute.xlu1 %499 }
 0x103   : > { %v1568_v30 = vld [vmem:[#allocation2 + $0x78] sm:$0xff]   ;;  %v503_v34 = vrot.slane %v496_v25, 4  ;;  %v504_v23 = vrot.slane %v500_v27, 4  ;;  %v874_v25 = vrot.slane %v869_v18, %v2085_v10 }
 0x104   : > { %346 = vrot.lane.b32.xlu1 %v341_v24, %s1822_s0  ;;  %344 = vrot.lane.b32.xlu0 %v340_v22, %s1822_s0  ;;  %v1297_v24 = vcombine.low %v567_v17, %v567_v17  ;;  %s1149_s0 = scalar_lea.sflag [#allocation5], %s2047_s4 }
 0x105   : > { %1389 = vmatprep.subr.bf16.mxu0 %v1568_v30 }
 0x106   : > { %v766_v33 = vpop.permute.xlu0 %765  ;;  %v770_v36 = vpop.permute.xlu1 %769  ;;  %v939_v59 = vld [vmem:[%s2362_s30] sm:$0xff]  ;;  %s1675_s30 = sshll.u32 %s1825_s6, 4  ;;  %s1676_s30 = int_to_ptr.vmem [resolvable:$false] %s1675_s30 }
 0x107   : > { %v773_v35 = vsel %vm717_vm0, %v771_v26, %v766_v33  ;;  %v774_v40 = vsel %vm717_vm0, %v772_v31, %v770_v36  ;;  %v1569_v41 = vld [vmem:[#allocation2 + $0x38] sm:$0xff]   ;;  %v1305_v33 = vcombine.low %v874_v25, %v874_v25 }
 0x108   : > { %844 = vrot.lane.b32.xlu1 %v2071_v3, %s1811_s2  ;;  %840 = vrot.lane.b32.xlu0 %v2074_v4, %s1811_s2  ;;  %v781_v39 = vmul.bf16 %v1302_v32, %v773_v35  ;;  %v782_v45 = vmul.bf16 %v1302_v32, %v774_v40 }
 0x109   : > { %1390 = vmatpush3.bf16.msra.mxu0 %v1569_v41 }
 0x10a   : > { %v498_v47 = vpop.permute.xlu0 %497  ;;  %v1381_v48 = vcombine.low %v781_v39, %v782_v45  ;;  %v502_v49 = vpop.permute.xlu1 %501 }
 0x10b   : > { %v505_v3 = vsel %vm373_vm2, %v503_v34, %v498_v47  ;;  %v506_v50 = vsel %vm373_vm2, %v504_v23, %v502_v49 }
 0x10c   : > { %846 = vrot.lane.b32.xlu1 %v827_v43, %s1811_s2  ;;  %842 = vrot.lane.b32.xlu0 %v825_v44, %s1811_s2  ;;  %v513_v4 = vmul.bf16 %v1295_v37, %v505_v3  ;;  %1382 = vst [vmem:[#allocation2 + $0x70] sm:$0xff] %v1381_v48   ;;  %v514_v52 = vmul.bf16 %v1295_v37, %v506_v50  ;;  %s1289_s2 = sshll.u32 %s2047_s4, 3 }
 0x10d   : > { %s282_s21 = scalar_lea.vmem [#allocation9], %s1289_s2 }
 0x10e   : > { %v458_v53 = vpop.permute.xlu0 %457  ;;  %v1375_v54 = vcombine.low %v513_v4, %v514_v52  ;;  %v462_v56 = vpop.permute.xlu1 %461  ;;  %s1164_s14 = sshll.u32 %s282_s21, 4  ;;  %s2267_s14 = int_to_ptr.vmem [resolvable:$true] %s1164_s14 }
 0x10f   : > { %v465_v55 = vrot.slane %v458_v53, 4  ;;  %v466_v57 = vrot.slane %v462_v56, 4  ;;  %s1671_s22 = scalar_lea.vmem %s2267_s14, 128  ;;  %p1678_p1 = scmp.lt.s32.totalorder %s2267_s14, %s1676_s30 }
 0x110   : > { %1376 = vst [vmem:[#allocation2 + $0x30] sm:$0xff] %v1375_v54   ;;  %942 = vperm.xlu0 %1567, %v939_v59   ;;  %p1672_p11 = scmp.ne.s32.totalorder %s2267_s14, %s1671_s22 }
 0x112   : > { %v460_v2 = vpop.permute.xlu0 %459  ;;  %v464_v0 = vpop.permute.xlu1 %463  ;;  %p1673_p0 = pnand %p1672_p11, %p2366_p7 }
 0x113   : > { %v467_v63 = vsel %vm410_vm5, %v465_v55, %v460_v2  ;;  %v468_v6 = vsel %vm410_vm5, %v466_v57, %v464_v0  ;;  %v1570_v7 = vld [vmem:[#allocation2 + $0x70] sm:$0xff]  }
 0x114   : > { %v475_v5 = vmul.bf16 %v1294_v58, %v467_v63  ;;  %v476_v11 = vmul.bf16 %v1294_v58, %v468_v6  ;;  %1391 = vmatprep.subr.bf16.mxu0 %v1570_v7  ;;  %v1576_v58 = vld [vmem:[#allocation2 + $0x20] sm:$0xff]   ;;  %p1674_p2 = pneg %p1673_p0 }
 0x116   : > { %v573_v12 = vpop.permute.xlu0 %572  ;;  %v1373_v13 = vcombine.low %v475_v5, %v476_v11  ;;  %v577_v14 = vpop.permute.xlu1 %576 }
 0x117   : > { %v1571_v16 = vld [vmem:[#allocation2 + $0x30] sm:$0xff]   ;;  %v580_v20 = vrot.slane %v573_v12, 4  ;;  %v581_v22 = vrot.slane %v577_v14, 4 }
 0x118   : > { %1374 = vst [vmem:[#allocation2 + $0x28] sm:$0xff] %v1373_v13   ;;  %1392 = vmatpush3.bf16.msra.mxu0 %v1571_v16 }
 0x119   : > { %1393 = vmatprep.subr.bf16.mxu0 %v1572_v15 }
 0x11a   : > { %v880_v19 = vpop.permute.xlu0 %879  ;;  %v884_v21 = vpop.permute.xlu1 %883 }
 0x11b   : > { %v887_v27 = vrot.slane %v880_v19, 4  ;;  %v888_v30 = vrot.slane %v884_v21, 4 }
 0x11e   : > { %v575_v26 = vpop.permute.xlu0 %574  ;;  %v579_v29 = vpop.permute.xlu1 %578 }
 0x11f   : > { %v582_v28 = vsel %vm300_vm3, %v580_v20, %v575_v26  ;;  %v583_v32 = vsel %vm300_vm3, %v581_v22, %v579_v29  ;;  %v1573_v34 = vld [vmem:[#allocation2 + $0x28] sm:$0xff]   ;;  %v828_v20 = vld [vmem:[%s2061_s15 + $0x8] sm:$0x1]  ;;  %s2363_s15 = sld [smem:[#allocation15_spill]] }
 0x120   : > { %v590_v31 = vmul.bf16 %v1297_v24, %v582_v28  ;;  %v591_v35 = vmul.bf16 %v1297_v24, %v583_v32  ;;  %1394 = vmatpush3.bf16.msra.mxu0 %v1573_v34  ;;  %v830_v26 = vpack.i.b16 %v828_v20, %v828_v20 }
 0x122   : > { %v882_v36 = vpop.permute.xlu0 %881  ;;  %v1379_v37 = vcombine.low %v590_v31, %v591_v35  ;;  %v886_v39 = vpop.permute.xlu1 %885  ;;  %v835_v34 = vrot.slane %v830_v26, %v2085_v10 }
 0x123   : > { %v889_v23 = vsel %vm611_vm6, %v887_v27, %v882_v36  ;;  %v890_v41 = vsel %vm611_vm6, %v888_v30, %v886_v39 }
 0x124   : > { %v897_v40 = vmul.bf16 %v1305_v33, %v889_v23  ;;  %1380 = vst [vmem:[#allocation2 + $0x40] sm:$0xff] %v1379_v37   ;;  %v898_v42 = vmul.bf16 %v1305_v33, %v890_v41 }
 0x125   : > { %s1329_s11 = sshll.u32 %s2363_s15, 1  ;;  %s1677_s15 = scalar_lea.vmem %s1676_s30, 256 }
 0x126   : > { %v1387_v43 = vcombine.low %v897_v40, %v898_v42  ;;  %v1304_v42 = vcombine.low %v835_v34, %v835_v34  ;;  %s1160_s5 = sadd.s32 %s2364_s27, %s1329_s11  ;;  %p1679_p6 = scmp.lt.s32.totalorder %s1677_s15, %s1671_s22 }
 0x127   : > { %s1330_s9 = sshll.u32 %s1160_s5, 7 }
 0x128   : > { %1388 = vst [vmem:[#allocation2 + $0x88] sm:$0xff] %v1387_v43   ;;  %s2265_s8 = scalar_lea.hbm %s2365_s7, %s1330_s9  ;;  %p1680_p10 = por %p1679_p6, %p1678_p1 }
 0x12a   : > { %p1681_p9 = pnand %p1680_p10, %p1674_p2 }
 0x12f   : > { %v1574_v44 = vld [vmem:[#allocation2 + $0x88] sm:$0xff]  }
 0x130   : > { %1415 = vmatpush3.bf16.msra.mxu1 %v1574_v44 }
 0x131   : > { %1416 = vmatprep.subr.bf16.mxu1 %v1817_v61 }
 0x15a   : > { %v725_v45 = vpop.permute.xlu0 %724  ;;  %v727_v46 = vpop.permute.xlu1 %726 }
 0x15b   : > { %v728_v47 = vrot.slane %v725_v45, 4  ;;  %v729_v48 = vrot.slane %v727_v46, 4 }
 0x15d   : > { %v731_v3 = vsel %vm730_vm9, %v725_v45, %v728_v47  ;;  %v732_v49 = vsel %vm730_vm9, %v727_v46, %v729_v48 }
 0x15e   : > { %735 = vst [vmem:[#allocation2 + $0x60] sm:$0xf] %v731_v3  ;;  %736 = vst [vmem:[#allocation2 + $0x64] sm:$0xf] %v732_v49  ;;  %v655_v4 = vpop.permute.xlu0 %654  ;;  %v657_v50 = vpop.permute.xlu1 %656 }
 0x15f   : > { %v658_v51 = vrot.slane %v655_v4, 4  ;;  %v659_v52 = vrot.slane %v657_v50, 4 }
 0x161   : > { %v660_v53 = vsel %vm647_vm1, %v655_v4, %v658_v51  ;;  %v661_v54 = vsel %vm647_vm1, %v657_v50, %v659_v52  ;;  %v1583_v51 = vld [vmem:[#allocation2 + $0x40] sm:$0xff]  }
 0x162   : > { %664 = vst [vmem:[#allocation2 + $0x50] sm:$0xf] %v660_v53  ;;  %665 = vst [vmem:[#allocation2 + $0x54] sm:$0xf] %v661_v54  ;;  %v381_v61 = vpop.permute.xlu0 %380  ;;  %v383_v55 = vpop.permute.xlu1 %382  ;;  %v1306_v53 = vcombine.low %v2212_v38, %v2212_v38 }
 0x163   : > { %v384_v56 = vrot.slane %v381_v61, 4  ;;  %v385_v57 = vrot.slane %v383_v55, 4 }
 0x165   : > { %v387_v59 = vsel %vm386_vm10, %v381_v61, %v384_v56  ;;  %v388_v60 = vsel %vm386_vm10, %v383_v55, %v385_v57  ;;  %v1575_v62 = vld [vmem:[#allocation2 + $0x60] sm:$0xff]   ;;  %v1588_v61 = vld [vmem:[#allocation6 + $0x8] ss:$0 sps:$4 sm:$0xff]  }
 0x166   : > { %391 = vst [vmem:[#allocation2 + $0x10] sm:$0xf] %v387_v59  ;;  %392 = vst [vmem:[#allocation2 + $0x14] sm:$0xf] %v388_v60  ;;  %v310_v1 = vpop.permute.xlu1 %309  ;;  %v308_v2 = vpop.permute.xlu0 %307  ;;  %1395 = vmatprep.subr.bf16.mxu0 %v1575_v62 }
 0x167   : > { %v312_v63 = vrot.slane %v310_v1, 4  ;;  %v311_v0 = vrot.slane %v308_v2, 4  ;;  %1396 = vmatpush3.bf16.msra.mxu0 %v1576_v58 }
 0x169   : > { %v315_v5 = vsel %vm313_vm11, %v310_v1, %v312_v63  ;;  %v314_v6 = vsel %vm313_vm11, %v308_v2, %v311_v0  ;;  %v1579_v40 = vld [vmem:[#allocation2 + $0x50] sm:$0xff]  }
 0x16a   : > { %319 = vst [vmem:[#allocation2 + $0x4] sm:$0xf] %v315_v5  ;;  %318 = vst [vmem:[#allocation2] sm:$0xf] %v314_v6  ;;  %v692_v7 = vpop.permute.xlu1 %691  ;;  %v690_v8 = vpop.permute.xlu0 %689 }
 0x16b   : > { %v694_v9 = vrot.slane %v692_v7, 4  ;;  %v693_v11 = vrot.slane %v690_v8, 4 }
 0x16d   : > { %v696_v12 = vsel %vm611_vm6, %v692_v7, %v694_v9  ;;  %v695_v13 = vsel %vm611_vm6, %v690_v8, %v693_v11  ;;  %v1580_v43 = vld [vmem:[#allocation2 + $0x10] sm:$0xff]  }
 0x16e   : > { %700 = vst [vmem:[#allocation2 + $0x5c] sm:$0xf] %v696_v12  ;;  %699 = vst [vmem:[#allocation2 + $0x58] sm:$0xf] %v695_v13  ;;  %v420_v14 = vpop.permute.xlu1 %419  ;;  %v418_v15 = vpop.permute.xlu0 %417 }
 0x16f   : > { %v422_v16 = vrot.slane %v420_v14, 4  ;;  %v421_v17 = vrot.slane %v418_v15, 4 }
 0x171   : > { %v425_v18 = vsel %vm423_vm12, %v420_v14, %v422_v16  ;;  %v424_v19 = vsel %vm423_vm12, %v418_v15, %v421_v17  ;;  %v1584_v52 = vld [vmem:[#allocation2] sm:$0xff]  }
 0x172   : > { %429 = vst [vmem:[#allocation2 + $0x1c] sm:$0xf] %v425_v18  ;;  %428 = vst [vmem:[#allocation2 + $0x18] sm:$0xf] %v424_v19  ;;  %v621_v21 = vpop.permute.xlu1 %620  ;;  %v619_v22 = vpop.permute.xlu0 %618 }
 0x173   : > { %v623_v24 = vrot.slane %v621_v21, 4  ;;  %v622_v25 = vrot.slane %v619_v22, 4 }
 0x175   : > { %v626_v27 = vsel %vm624_vm4, %v621_v21, %v623_v24  ;;  %v625_v28 = vsel %vm624_vm4, %v619_v22, %v622_v25  ;;  %v1577_v29 = vld [vmem:[#allocation2 + $0x58] sm:$0xff]  }
 0x176   : > { %630 = vst [vmem:[#allocation2 + $0x4c] sm:$0xf] %v626_v27  ;;  %629 = vst [vmem:[#allocation2 + $0x48] sm:$0xf] %v625_v28  ;;  %v347_v30 = vpop.permute.xlu1 %346  ;;  %v345_v31 = vpop.permute.xlu0 %344  ;;  %1397 = vmatprep.subr.bf16.mxu0 %v1577_v29 }
 0x177   : > { %v349_v32 = vrot.slane %v347_v30, 4  ;;  %v348_v33 = vrot.slane %v345_v31, 4 }
 0x179   : > { %v352_v35 = vsel %vm350_vm13, %v347_v30, %v349_v32  ;;  %v351_v36 = vsel %vm350_vm13, %v345_v31, %v348_v33  ;;  %v1578_v37 = vld [vmem:[#allocation2 + $0x18] sm:$0xff]  }
 0x17a   : > { %356 = vst [vmem:[#allocation2 + $0xc] sm:$0xf] %v352_v35  ;;  %355 = vst [vmem:[#allocation2 + $0x8] sm:$0xf] %v351_v36  ;;  %v845_v23 = vpop.permute.xlu1 %844  ;;  %v841_v39 = vpop.permute.xlu0 %840  ;;  %1398 = vmatpush3.bf16.msra.mxu0 %v1578_v37 }
 0x17b   : > { %v849_v41 = vrot.slane %v845_v23, 4  ;;  %1399 = vmatprep.subr.bf16.mxu0 %v1579_v40  ;;  %v848_v44 = vrot.slane %v841_v39, 4 }
 0x17d   : > { %v1581_v45 = vld [vmem:[#allocation2 + $0x48] sm:$0xff]  }
 0x17e   : > { %v847_v46 = vpop.permute.xlu1 %846  ;;  %v843_v47 = vpop.permute.xlu0 %842  ;;  %1400 = vmatpush3.bf16.msra.mxu0 %v1580_v43 }
 0x17f   : > { %v851_v10 = vsel %vm647_vm1, %v849_v41, %v847_v46  ;;  %v850_v48 = vsel %vm647_vm1, %v848_v44, %v843_v47  ;;  %1401 = vmatprep.subr.bf16.mxu0 %v1581_v45 }
 0x180   : > { %v859_v3 = vmul.bf16 %v1304_v42, %v851_v10  ;;  %v858_v49 = vmul.bf16 %v1304_v42, %v850_v48 }
 0x181   : > { %v1582_v4 = vld [vmem:[#allocation2 + $0x8] sm:$0xff]  }
 0x182   : > { %v1385_v50 = vcombine.low %v858_v49, %v859_v3  ;;  %1402 = vmatpush3.bf16.msra.mxu0 %v1582_v4 }
 0x183   : > { %1403 = vmatprep.subr.bf16.mxu0 %v1583_v51 }
 0x184   : > { %1386 = vst [vmem:[#allocation2 + $0x80] sm:$0xff] %v1385_v50  }
 0x186   : > { %1404 = vmatpush3.bf16.msra.mxu0 %v1584_v52 }
 0x189   : > { %1100 = vmatmul.mubr.bf16.vlgmr.msra.gmra.mxu0 %v1306_v53 }
 0x18b   : > { %v1587_v54 = vld [vmem:[#allocation2 + $0x80] sm:$0xff]   ;;  %v943_v57 = vpop.permute.xlu0 %942 }
 0x18c   : > { %1417 = vmatpush3.bf16.msra.mxu1 %v1587_v54 }
 0x18f   : > { %1419 = vmatmul.mubr.msk.bf16.vlgmr.msra.gmra.mxu1 %vm350_vm13, %v1588_v61 }
 0x249   : > { %v1405_v55 = vpop.f32.mrf.mxu0 }
 0x24b   : > { %v1406_v56 = vpop.f32.mrf.mxu0 }
 0x24c   : > { %v1407_v58 = vadd.f32 %v1406_v56, %v1405_v55 }
 0x24d   : > { %v1408_v59 = vpop.f32.mrf.mxu0 }
 0x24e   : > { %v1102_v38 = vadd.f32 %v1407_v58, %v943_v57 }
 0x24f   : > { %v1409_v60 = vpop.f32.mrf.mxu0  ;;  %v1141_v62 = vpop.f32.mrf.mxu1 }
 0x250   : > { %v1142_v1 = vadd.f32 %v1141_v62, %v1102_v38 }
 0x251   : > { %v1420_v2 = vpop.f32.mrf.mxu1 }
 0x252   : > { %1147 = vst [vmem:[%s282_s21] sm:$0xff] %v1142_v1 }
 0x253   : > { %v1144_v63 = vpop.f32.mrf.mxu1 }
 0x254   : > { %1684 = shalt.err (!%p1681_p9)
}
 0x255   : > { %s1685_s27 = scalar_lea.hbm %s2265_s8, 128  ;;  %s1689_s11 = scalar_lea.hbm %s2365_s7, 512 }
 0x256   : > { %p1686_p12 = scmp.ne.s32.totalorder %s2265_s8, %s1685_s27  ;;  %p1690_p5 = scmp.lt.s32.totalorder %s2265_s8, %s2365_s7 }
 0x257   : > { %p1691_p3 = scmp.lt.s32.totalorder %s1689_s11, %s1685_s27 }
 0x258   : > { %p1687_p13 = pnand %p1686_p12, %p2366_p7 }
 0x259   : > { %p1692_p8 = por %p1691_p3, %p1690_p5 }
 0x25a   : > { %p1688_p4 = pneg %p1687_p13 }
 0x25c   : > { %p1693_p11 = pnand %p1692_p8, %p1688_p4 }
 0x25e   : > { %1696 = shalt.err (!%p1693_p11)
}
 0x25f   : > { %1436 = dma.vmem_to_hbm [thread:$0]  (%p2366_p7), %s2267_s14, 128, %s2265_s8, %s1149_s0   ;;  %v1421_v0 = vpop.f32.mrf.mxu1 }
 0x260 PF: > { %p1456_p0 = scmp.ge.s32.totalorder %s1799_s25, 2  ;;  %s1176_s21 = sand.u32 1, %s1771_s18  }
 0x261   : > { %p2367_p2 = scmp.ne.s32.totalorder %s2353_s29, 0  ;;  %s1177_s13 = scalar_lea.sflag [#allocation5], %s1176_s21 }
 0x263   : > { %p1450_p1 = pnand %p1456_p0, %p2367_p2 }
 0x265   : > { %p1451_p6 = pneg %p1450_p1 }
 0x267   : > { %1754 = dma.done.wait (%p1451_p6), %s1177_s13, 128  }
 0x268   : > { %1756 = vsyncadd (%p1451_p6), %s1177_s13, 4294967168  ;;  %s21_s25 = sadd.s32 1, %s1799_s25   ;;  %s2368_s26 = sld [smem:[#allocation16_spill]] }
 0x269   : > { %p18_p10 = scmp.ge.s32.totalorder %s21_s25, 6   ;;  %s2369_s14 = sld [smem:[#allocation17_spill]] }
 0x26a   : > { %s2370_s15 = smov %s1763_s16  ;;  %s2371_s16 = smov %s1767_s17 }
 0x26b   : > { %s2372_s17 = smov %s1971_s10  ;;  %s2373_s18 = smov %s1775_s19 }
 0x26c   : > { %s2374_s19 = smov %s1779_s20  ;;  %s2375_s20 = smov %s1940_s12 }
 0x26d   : > { %s2376_s21 = smov %s1791_s23  ;;  %s2377_s22 = smov %s1795_s24 }
 0x26e   : > { %s2378_s23 = smov %s2368_s26  ;;  %20 = sbr.rel (!%p18_p10) target bundleno = 14 (0xe), region = 96 }
 0x26f   : > { %s2379_s24 = smov %s2369_s14 }
 0x273   :  { %1182 = vsyncpa [#allocation4], 1 }
 0x274   :  { %1184 = vsyncpa [#allocation4 + $0x1], 1 }
 0x275   :  { %1185 = vsyncpa [#allocation7], 1 }
 0x276   :  { %1186 = vsyncpa [#allocation5], 1 }
 0x277   :  { %1188 = vsyncpa [#allocation5 + $0x1], 1 }

</bundles_post_ra>
